<compile_context>
chip_gen: v6e
topology: v6e:2x2x1
jax: 0.10.0
libtpu: 0.0.40
codegen_flags: <defaults>
</compile_context>

<pallas_src>
import math
from functools import partial

import jax
import jax.numpy as jnp
from jax.experimental import pallas as pl
from jax.experimental.pallas import tpu as pltpu


def _layer_norm(y, w, b, eps=1e-5):
    mu = jnp.mean(y, axis=-1, keepdims=True)
    var = jnp.mean((y - mu) ** 2, axis=-1, keepdims=True)
    return (y - mu) * jax.lax.rsqrt(var + eps) * w + b


def transformer_kernel(src_ref, pe_ref, enc_w_ref, wqkv_ref, wo_ref,
                       ff1w_ref, ff2w_ref, lvecs_ref, dec_ref,
                       out_ref, *, B, S, n_layers, n_heads):
    f32 = jnp.float32
    bf16 = jnp.bfloat16
    d = enc_w_ref.shape[1]
    dff = ff1w_ref.shape[2]
    hd = d // n_heads
    M = B * S

    # encoder Linear (sqrt(d_model) and enc bias are pre-folded host-side)
    # + positional encoding slab.
    x = jnp.dot(src_ref[...].astype(bf16), enc_w_ref[...],
                preferred_element_type=f32) + pe_ref[...]            # [M, d] f32

    for l in range(n_layers):
        vecs = lvecs_ref[l]                                           # [8, W] f32
        bqkv = vecs[0:1, 0:3 * d]
        ff1b = vecs[1:2, 0:dff]
        ob   = vecs[2:3, 0:d]
        ln1w = vecs[3:4, 0:d]
        ln1b = vecs[4:5, 0:d]
        ln2w = vecs[5:6, 0:d]
        ln2b = vecs[6:7, 0:d]
        ff2b = vecs[7:8, 0:d]

        # ---- fused QKV projection: one lane-dense matmul per layer ----
        # (1/sqrt(head_dim) is pre-folded into the Q columns of wqkv/bqkv.)
        qkv = jnp.dot(x.astype(bf16), wqkv_ref[l],
                      preferred_element_type=f32) + bqkv              # [M, 3d]

        # ---- head-stacked views [n_heads*B, S, hd] ----
        # Built from lane slices + a leading-dim (sublane-direction) concat +
        # leading-dim-only reshape; the lane dim is never reshaped.
        def stack_heads(base):
            parts = [qkv[:, base + h * hd: base + (h + 1) * hd]
                     for h in range(n_heads)]
            return jnp.concatenate(parts, axis=0).reshape(n_heads * B, S, hd)

        qs = stack_heads(0).astype(bf16)
        ks = stack_heads(d).astype(bf16)
        vs = stack_heads(2 * d).astype(bf16)

        # ---- ONE batched einsum pair for all heads & batch items ----
        s = jnp.einsum('bqe,bke->bqk', qs, ks,
                       preferred_element_type=f32)                    # [H*B, S, S]
        s = s - jnp.max(s, axis=-1, keepdims=True)
        p = jnp.exp(s)
        p = p * pl.reciprocal(jnp.sum(p, axis=-1, keepdims=True), approx=True)
        ctx = jnp.einsum('bqk,bke->bqe', p.astype(bf16), vs,
                         preferred_element_type=f32)                  # [H*B, S, hd]
        ctx = ctx.reshape(n_heads, M, hd)

        # ---- output projection accumulated per head (no lane concat) ----
        # attn[m, :] = sum_h ctx[h, m, :] @ Wo[h*hd:(h+1)*hd, :]
        attn = ob + jnp.dot(ctx[0].astype(bf16), wo_ref[l, 0:hd, :],
                            preferred_element_type=f32)
        for h in range(1, n_heads):
            attn = attn + jnp.dot(ctx[h].astype(bf16),
                                  wo_ref[l, h * hd:(h + 1) * hd, :],
                                  preferred_element_type=f32)
        x = _layer_norm(x + attn, ln1w, ln1b)

        # ---- feed-forward (relu) + residual + LayerNorm ----
        hdn = jnp.dot(x.astype(bf16), ff1w_ref[l],
                      preferred_element_type=f32) + ff1b
        hdn = jnp.maximum(hdn, 0.0)
        ff = jnp.dot(hdn.astype(bf16), ff2w_ref[l],
                     preferred_element_type=f32) + ff2b
        x = _layer_norm(x + ff, ln2w, ln2b)

    # decoder Linear on token 0 of each sequence (output[:, 0, :]).
    # S == 8 == sublane-tile height, so this reshape is a pure reinterpretation
    # and the row pick is a cheap sublane gather; bias rides as the last row
    # of the decoder slab.  Final matmul kept in f32 (it is tiny).
    first = x.reshape(B, S, d)[:, 0, :]                               # [B, d]
    out_ref[...] = (jnp.dot(first, dec_ref[0:d, :],
                            preferred_element_type=f32)
                    + dec_ref[d:d + 1, :])


def transformer_forward(src, kparams, *, n_layers, n_heads):
    """src: [B, S, input_size].  For production, batch sequences so B*S >= 128
    before calling (then a 'parallel' batch grid axis also pays off on v7x)."""
    B, S, I = src.shape
    out_size = kparams["dec"].shape[1]
    args = [src.reshape(B * S, I), kparams["pe_b"], kparams["enc_w"],
            kparams["wqkv"], kparams["wo"], kparams["ff1w"], kparams["ff2w"],
            kparams["lvecs"], kparams["dec"]]
    kernel = partial(transformer_kernel, B=B, S=S,
                     n_layers=n_layers, n_heads=n_heads)
    return pl.pallas_call(
        kernel,
        out_shape=jax.ShapeDtypeStruct((B, out_size), jnp.float32),
        in_specs=[pl.BlockSpec(memory_space=pltpu.MemorySpace.VMEM)] * len(args),
        out_specs=pl.BlockSpec(memory_space=pltpu.MemorySpace.VMEM),
    )(*args)


# ----------------------------- host-side prep -------------------------------

def positional_encoding(max_len, d_model):
    position = jnp.arange(max_len, dtype=jnp.float32)[:, None]
    div_term = jnp.exp(jnp.arange(0, d_model, 2, dtype=jnp.float32)
                       * (-math.log(10000.0) / d_model))
    pe = jnp.zeros((max_len, d_model), jnp.float32)
    pe = pe.at[:, 0::2].set(jnp.sin(position * div_term))
    pe = pe.at[:, 1::2].set(jnp.cos(position * div_term))
    return pe


def pack_params(raw, *, batch, seq_len, n_heads):
    """One-time host-side packing: fold sqrt(d_model) / 1/sqrt(hd) into weights,
    fold enc_b into the PE slab, pack all small per-layer vectors into one
    [L, 8, W] array, append dec_b as the last row of the decoder slab, and
    pre-cast matmul weights to bf16."""
    f32, bf16 = jnp.float32, jnp.bfloat16
    I, d = raw["enc_w"].shape
    L, _, dff = raw["ff1w"].shape
    sqrt_d = math.sqrt(d)
    qscale = 1.0 / math.sqrt(d // n_heads)

    col_scale = jnp.concatenate([jnp.full((d,), qscale, f32),
                                 jnp.ones((2 * d,), f32)])            # [3d]
    wqkv = (raw["wqkv"] * col_scale).astype(bf16)                     # [L, d, 3d]
    bqkv = (raw["bqkv"] * col_scale).astype(f32)                      # [L, 3d]

    enc_w = (raw["enc_w"] * sqrt_d).astype(bf16)
    pe_b = (jnp.tile(raw["pe"][:seq_len], (batch, 1))
            + raw["enc_b"] * sqrt_d).astype(f32)                      # [B*S, d]

    W = max(3 * d, dff, d)

    def pad_row(v):                                                   # [L,n]->[L,1,W]
        return jnp.pad(v, ((0, 0), (0, W - v.shape[1])))[:, None, :]

    lvecs = jnp.concatenate(
        [pad_row(bqkv), pad_row(raw["ff1b"]), pad_row(raw["ob"]),
         pad_row(raw["ln1w"]), pad_row(raw["ln1b"]),
         pad_row(raw["ln2w"]), pad_row(raw["ln2b"]),
         pad_row(raw["ff2b"])], axis=1).astype(f32)                   # [L, 8, W]

    dec = jnp.concatenate([raw["dec_w"], raw["dec_b"][None, :]],
                          axis=0).astype(f32)                         # [d+1, out]

    return dict(pe_b=pe_b, enc_w=enc_w, wqkv=wqkv,
                wo=raw["wo"].astype(bf16),
                ff1w=raw["ff1w"].astype(bf16), ff2w=raw["ff2w"].astype(bf16),
                lvecs=lvecs, dec=dec)


def reference_forward(src, raw, *, n_layers, n_heads):
    """Pure-JAX f32 reference matching the PyTorch module semantics."""
    B, S, I = src.shape
    d = raw["enc_w"].shape[1]
    hd = d // n_heads
    scale = 1.0 / math.sqrt(hd)

    def ln(y, w, b, eps=1e-5):
        mu = y.mean(-1, keepdims=True)
        var = ((y - mu) ** 2).mean(-1, keepdims=True)
        return (y - mu) / jnp.sqrt(var + eps) * w + b

    x = src.reshape(B * S, I) @ raw["enc_w"] + raw["enc_b"]
    x = x * math.sqrt(d) + jnp.tile(raw["pe"][:S], (B, 1))
    for l in range(n_layers):
        qkv = x @ raw["wqkv"][l] + raw["bqkv"][l]
        q, k, v = qkv[:, :d], qkv[:, d:2 * d], qkv[:, 2 * d:]
        q = q.reshape(B, S, n_heads, hd).transpose(0, 2, 1, 3)
        k = k.reshape(B, S, n_heads, hd).transpose(0, 2, 1, 3)
        v = v.reshape(B, S, n_heads, hd).transpose(0, 2, 1, 3)
        p = jax.nn.softmax(jnp.einsum('bhqe,bhke->bhqk', q, k) * scale, axis=-1)
        ctx = jnp.einsum('bhqk,bhke->bhqe', p, v)
        ctx = ctx.transpose(0, 2, 1, 3).reshape(B * S, d)
        x = ln(x + ctx @ raw["wo"][l] + raw["ob"][l], raw["ln1w"][l], raw["ln1b"][l])
        h1 = jnp.maximum(x @ raw["ff1w"][l] + raw["ff1b"][l], 0.0)
        x = ln(x + h1 @ raw["ff2w"][l] + raw["ff2b"][l], raw["ln2w"][l], raw["ln2b"][l])
    first = x.reshape(B, S, d)[:, 0, :]
    return first @ raw["dec_w"] + raw["dec_b"]


if __name__ == "__main__":
    INPUT_SIZE = 4
    D_MODEL = 32
    N_HEAD = 4
    N_LAYERS = 2
    DIM_FF = 64
    OUTPUT_SIZE = 1
    SEQ_LEN = 8
    BATCH = 2

    key = jax.random.PRNGKey(0)
    keys = jax.random.split(key, 12)

    def u(k, shape, s=0.1):
        return jax.random.uniform(k, shape, jnp.float32, -s, s)

    # Raw f32 parameters mirroring the PyTorch module (weights pre-transposed
    # to [in, out]; QKV columns ordered q|k|v with heads contiguous).
    raw = dict(
        enc_w=u(keys[0], (INPUT_SIZE, D_MODEL)),
        enc_b=u(keys[1], (D_MODEL,)),
        pe=positional_encoding(SEQ_LEN + 20, D_MODEL),
        wqkv=u(keys[2], (N_LAYERS, D_MODEL, 3 * D_MODEL)),
        bqkv=u(keys[3], (N_LAYERS, 3 * D_MODEL)),
        wo=u(keys[4], (N_LAYERS, D_MODEL, D_MODEL)),
        ob=u(keys[5], (N_LAYERS, D_MODEL)),
        ln1w=jnp.ones((N_LAYERS, D_MODEL), jnp.float32),
        ln1b=jnp.zeros((N_LAYERS, D_MODEL), jnp.float32),
        ln2w=jnp.ones((N_LAYERS, D_MODEL), jnp.float32),
        ln2b=jnp.zeros((N_LAYERS, D_MODEL), jnp.float32),
        ff1w=u(keys[6], (N_LAYERS, D_MODEL, DIM_FF)),
        ff1b=u(keys[7], (N_LAYERS, DIM_FF)),
        ff2w=u(keys[8], (N_LAYERS, DIM_FF, D_MODEL)),
        ff2b=u(keys[9], (N_LAYERS, D_MODEL)),
        dec_w=u(keys[10], (D_MODEL, OUTPUT_SIZE)),
        dec_b=jnp.zeros((OUTPUT_SIZE,), jnp.float32),   # decoder.bias zeroed
    )
    src = jax.random.normal(keys[11], (BATCH, SEQ_LEN, INPUT_SIZE), jnp.float32)

    kparams = pack_params(raw, batch=BATCH, seq_len=SEQ_LEN, n_heads=N_HEAD)

    out = transformer_forward(src, kparams, n_layers=N_LAYERS, n_heads=N_HEAD)
    out = jax.block_until_ready(out)

    ref = reference_forward(src, raw, n_layers=N_LAYERS, n_heads=N_HEAD)
    assert out.shape == (BATCH, OUTPUT_SIZE)
    # tolerance covers the bf16 matmul operands and the approximate EUP
    # reciprocal in the softmax denominator (f32 accumulation throughout).
    assert jnp.allclose(out, ref, rtol=2e-2, atol=2e-2), (out, ref)
    print("KERNEL_OK")
</pallas_src>

<mosaic_0001>
module attributes {stable_mosaic.version = 11 : i64} {
  func.func @transformer_kernel(%arg0: memref<16x4xf32, #tpu.memory_space<vmem>>, %arg1: memref<16x32xf32, #tpu.memory_space<vmem>>, %arg2: memref<4x32xbf16, #tpu.memory_space<vmem>>, %arg3: memref<2x32x96xbf16, #tpu.memory_space<vmem>>, %arg4: memref<2x32x32xbf16, #tpu.memory_space<vmem>>, %arg5: memref<2x32x64xbf16, #tpu.memory_space<vmem>>, %arg6: memref<2x64x32xbf16, #tpu.memory_space<vmem>>, %arg7: memref<2x8x96xf32, #tpu.memory_space<vmem>>, %arg8: memref<33x1xf32, #tpu.memory_space<vmem>>, %arg9: memref<2x1xf32, #tpu.memory_space<vmem>>) attributes {dimension_semantics = [], scalar_prefetch = 0 : i64, scratch_operands = 0 : i64, tpu.core_type = #tpu.core_type<tc>} {
    %c0 = arith.constant 0 : index
    %c0_0 = arith.constant 0 : index
    %0 = vector.load %arg0[%c0, %c0_0] : memref<16x4xf32, #tpu.memory_space<vmem>>, vector<16x4xf32>
    %1 = arith.truncf %0 : vector<16x4xf32> to vector<16x4xbf16>
    %c0_1 = arith.constant 0 : index
    %c0_2 = arith.constant 0 : index
    %2 = vector.load %arg2[%c0_1, %c0_2] : memref<4x32xbf16, #tpu.memory_space<vmem>>, vector<4x32xbf16>
    %cst = arith.constant dense<0.000000e+00> : vector<16x32xf32>
    %3 = tpu.matmul %1, %2, %cst {dimension_numbers = #tpu.dot_dimension_numbers<[1], [0], [0], [1], [0, 0, 1, 1], [], []>} : vector<16x4xbf16>, vector<4x32xbf16>, vector<16x32xf32> -> vector<16x32xf32>
    %c0_3 = arith.constant 0 : index
    %c0_4 = arith.constant 0 : index
    %4 = vector.load %arg1[%c0_3, %c0_4] : memref<16x32xf32, #tpu.memory_space<vmem>>, vector<16x32xf32>
    %5 = arith.addf %3, %4 : vector<16x32xf32>
    %c0_5 = arith.constant 0 : index
    %c0_6 = arith.constant 0 : index
    %c0_7 = arith.constant 0 : index
    %6 = vector.load %arg7[%c0_5, %c0_6, %c0_7] : memref<2x8x96xf32, #tpu.memory_space<vmem>>, vector<1x8x96xf32>
    %7 = vector.shape_cast %6 : vector<1x8x96xf32> to vector<8x96xf32>
    %8 = vector.extract_strided_slice %7 {offsets = [0, 0], sizes = [1, 96], strides = [1, 1]} : vector<8x96xf32> to vector<1x96xf32>
    %9 = vector.extract_strided_slice %7 {offsets = [1, 0], sizes = [1, 64], strides = [1, 1]} : vector<8x96xf32> to vector<1x64xf32>
    %10 = vector.extract_strided_slice %7 {offsets = [2, 0], sizes = [1, 32], strides = [1, 1]} : vector<8x96xf32> to vector<1x32xf32>
    %11 = vector.extract_strided_slice %7 {offsets = [3, 0], sizes = [1, 32], strides = [1, 1]} : vector<8x96xf32> to vector<1x32xf32>
    %12 = vector.extract_strided_slice %7 {offsets = [4, 0], sizes = [1, 32], strides = [1, 1]} : vector<8x96xf32> to vector<1x32xf32>
    %13 = vector.extract_strided_slice %7 {offsets = [5, 0], sizes = [1, 32], strides = [1, 1]} : vector<8x96xf32> to vector<1x32xf32>
    %14 = vector.extract_strided_slice %7 {offsets = [6, 0], sizes = [1, 32], strides = [1, 1]} : vector<8x96xf32> to vector<1x32xf32>
    %15 = vector.extract_strided_slice %7 {offsets = [7, 0], sizes = [1, 32], strides = [1, 1]} : vector<8x96xf32> to vector<1x32xf32>
    %16 = arith.truncf %5 : vector<16x32xf32> to vector<16x32xbf16>
    %c0_8 = arith.constant 0 : index
    %c0_9 = arith.constant 0 : index
    %c0_10 = arith.constant 0 : index
    %17 = vector.load %arg3[%c0_8, %c0_9, %c0_10] : memref<2x32x96xbf16, #tpu.memory_space<vmem>>, vector<1x32x96xbf16>
    %18 = vector.shape_cast %17 : vector<1x32x96xbf16> to vector<32x96xbf16>
    %cst_11 = arith.constant dense<0.000000e+00> : vector<16x96xf32>
    %19 = tpu.matmul %16, %18, %cst_11 {dimension_numbers = #tpu.dot_dimension_numbers<[1], [0], [0], [1], [0, 0, 1, 1], [], []>} : vector<16x32xbf16>, vector<32x96xbf16>, vector<16x96xf32> -> vector<16x96xf32>
    %20 = vector.broadcast %8 : vector<1x96xf32> to vector<16x96xf32>
    %21 = arith.addf %19, %20 : vector<16x96xf32>
    %22 = vector.extract_strided_slice %21 {offsets = [0, 0], sizes = [16, 8], strides = [1, 1]} : vector<16x96xf32> to vector<16x8xf32>
    %23 = vector.extract_strided_slice %21 {offsets = [0, 8], sizes = [16, 8], strides = [1, 1]} : vector<16x96xf32> to vector<16x8xf32>
    %24 = vector.extract_strided_slice %21 {offsets = [0, 16], sizes = [16, 8], strides = [1, 1]} : vector<16x96xf32> to vector<16x8xf32>
    %25 = vector.extract_strided_slice %21 {offsets = [0, 24], sizes = [16, 8], strides = [1, 1]} : vector<16x96xf32> to vector<16x8xf32>
    %26 = tpu.concatenate %22, %23, %24, %25 in 0 : vector<16x8xf32>, vector<16x8xf32>, vector<16x8xf32>, vector<16x8xf32> -> vector<64x8xf32>
    %27 = vector.shape_cast %26 : vector<64x8xf32> to vector<8x8x8xf32>
    %28 = arith.truncf %27 : vector<8x8x8xf32> to vector<8x8x8xbf16>
    %29 = vector.extract_strided_slice %21 {offsets = [0, 32], sizes = [16, 8], strides = [1, 1]} : vector<16x96xf32> to vector<16x8xf32>
    %30 = vector.extract_strided_slice %21 {offsets = [0, 40], sizes = [16, 8], strides = [1, 1]} : vector<16x96xf32> to vector<16x8xf32>
    %31 = vector.extract_strided_slice %21 {offsets = [0, 48], sizes = [16, 8], strides = [1, 1]} : vector<16x96xf32> to vector<16x8xf32>
    %32 = vector.extract_strided_slice %21 {offsets = [0, 56], sizes = [16, 8], strides = [1, 1]} : vector<16x96xf32> to vector<16x8xf32>
    %33 = tpu.concatenate %29, %30, %31, %32 in 0 : vector<16x8xf32>, vector<16x8xf32>, vector<16x8xf32>, vector<16x8xf32> -> vector<64x8xf32>
    %34 = vector.shape_cast %33 : vector<64x8xf32> to vector<8x8x8xf32>
    %35 = arith.truncf %34 : vector<8x8x8xf32> to vector<8x8x8xbf16>
    %36 = vector.extract_strided_slice %21 {offsets = [0, 64], sizes = [16, 8], strides = [1, 1]} : vector<16x96xf32> to vector<16x8xf32>
    %37 = vector.extract_strided_slice %21 {offsets = [0, 72], sizes = [16, 8], strides = [1, 1]} : vector<16x96xf32> to vector<16x8xf32>
    %38 = vector.extract_strided_slice %21 {offsets = [0, 80], sizes = [16, 8], strides = [1, 1]} : vector<16x96xf32> to vector<16x8xf32>
    %39 = vector.extract_strided_slice %21 {offsets = [0, 88], sizes = [16, 8], strides = [1, 1]} : vector<16x96xf32> to vector<16x8xf32>
    %40 = tpu.concatenate %36, %37, %38, %39 in 0 : vector<16x8xf32>, vector<16x8xf32>, vector<16x8xf32>, vector<16x8xf32> -> vector<64x8xf32>
    %41 = vector.shape_cast %40 : vector<64x8xf32> to vector<8x8x8xf32>
    %42 = arith.truncf %41 : vector<8x8x8xf32> to vector<8x8x8xbf16>
    "tpu.trace_start"() <{level = 10 : i32, message = "bqe,bke->bqk"}> : () -> ()
    %cst_12 = arith.constant dense<0.000000e+00> : vector<8x8x8xf32>
    %43 = tpu.matmul %28, %35, %cst_12 {dimension_numbers = #tpu.dot_dimension_numbers<[2], [2], [1], [1], [0, 0, 0, 1, 1, 1], [0], [0]>} : vector<8x8x8xbf16>, vector<8x8x8xbf16>, vector<8x8x8xf32> -> vector<8x8x8xf32>
    "tpu.trace_stop"() : () -> ()
    %cst_13 = arith.constant dense<0xFF800000> : vector<8x8xf32>
    %44 = vector.multi_reduction <maximumf>, %43, %cst_13 [2] : vector<8x8x8xf32> to vector<8x8xf32>
    %45 = vector.shape_cast %44 : vector<8x8xf32> to vector<8x8x1xf32>
    %46 = vector.broadcast %45 : vector<8x8x1xf32> to vector<8x8x8xf32>
    %47 = arith.subf %43, %46 : vector<8x8x8xf32>
    %48 = math.exp %47 : vector<8x8x8xf32>
    %cst_14 = arith.constant dense<0.000000e+00> : vector<8x8xf32>
    %49 = vector.multi_reduction <add>, %48, %cst_14 [2] : vector<8x8x8xf32> to vector<8x8xf32>
    %50 = vector.shape_cast %49 : vector<8x8xf32> to vector<8x8x1xf32>
    %51 = tpu.reciprocal %50 {approx = true} : vector<8x8x1xf32> -> vector<8x8x1xf32>
    %52 = vector.broadcast %51 : vector<8x8x1xf32> to vector<8x8x8xf32>
    %53 = arith.mulf %48, %52 : vector<8x8x8xf32>
    %54 = arith.truncf %53 : vector<8x8x8xf32> to vector<8x8x8xbf16>
    "tpu.trace_start"() <{level = 10 : i32, message = "bqk,bke->bqe"}> : () -> ()
    %cst_15 = arith.constant dense<0.000000e+00> : vector<8x8x8xf32>
    %55 = tpu.matmul %54, %42, %cst_15 {dimension_numbers = #tpu.dot_dimension_numbers<[2], [1], [1], [2], [0, 0, 0, 1, 1, 2], [0], [0]>} : vector<8x8x8xbf16>, vector<8x8x8xbf16>, vector<8x8x8xf32> -> vector<8x8x8xf32>
    "tpu.trace_stop"() : () -> ()
    %56 = vector.shape_cast %55 : vector<8x8x8xf32> to vector<4x16x8xf32>
    %57 = vector.extract_strided_slice %56 {offsets = [0, 0, 0], sizes = [1, 16, 8], strides = [1, 1, 1]} : vector<4x16x8xf32> to vector<1x16x8xf32>
    %58 = vector.shape_cast %57 : vector<1x16x8xf32> to vector<16x8xf32>
    %59 = arith.truncf %58 : vector<16x8xf32> to vector<16x8xbf16>
    %c0_16 = arith.constant 0 : index
    %c0_17 = arith.constant 0 : index
    %c0_18 = arith.constant 0 : index
    %60 = vector.load %arg4[%c0_16, %c0_17, %c0_18] : memref<2x32x32xbf16, #tpu.memory_space<vmem>>, vector<1x8x32xbf16>
    %61 = vector.shape_cast %60 : vector<1x8x32xbf16> to vector<8x32xbf16>
    %cst_19 = arith.constant dense<0.000000e+00> : vector<16x32xf32>
    %62 = tpu.matmul %59, %61, %cst_19 {dimension_numbers = #tpu.dot_dimension_numbers<[1], [0], [0], [1], [0, 0, 1, 1], [], []>} : vector<16x8xbf16>, vector<8x32xbf16>, vector<16x32xf32> -> vector<16x32xf32>
    %63 = vector.broadcast %10 : vector<1x32xf32> to vector<16x32xf32>
    %64 = arith.addf %63, %62 : vector<16x32xf32>
    %65 = vector.extract_strided_slice %56 {offsets = [1, 0, 0], sizes = [1, 16, 8], strides = [1, 1, 1]} : vector<4x16x8xf32> to vector<1x16x8xf32>
    %66 = vector.shape_cast %65 : vector<1x16x8xf32> to vector<16x8xf32>
    %67 = arith.truncf %66 : vector<16x8xf32> to vector<16x8xbf16>
    %c0_20 = arith.constant 0 : index
    %c8 = arith.constant 8 : index
    %c0_21 = arith.constant 0 : index
    %68 = vector.load %arg4[%c0_20, %c8, %c0_21] : memref<2x32x32xbf16, #tpu.memory_space<vmem>>, vector<1x8x32xbf16>
    %69 = vector.shape_cast %68 : vector<1x8x32xbf16> to vector<8x32xbf16>
    %cst_22 = arith.constant dense<0.000000e+00> : vector<16x32xf32>
    %70 = tpu.matmul %67, %69, %cst_22 {dimension_numbers = #tpu.dot_dimension_numbers<[1], [0], [0], [1], [0, 0, 1, 1], [], []>} : vector<16x8xbf16>, vector<8x32xbf16>, vector<16x32xf32> -> vector<16x32xf32>
    %71 = arith.addf %64, %70 : vector<16x32xf32>
    %72 = vector.extract_strided_slice %56 {offsets = [2, 0, 0], sizes = [1, 16, 8], strides = [1, 1, 1]} : vector<4x16x8xf32> to vector<1x16x8xf32>
    %73 = vector.shape_cast %72 : vector<1x16x8xf32> to vector<16x8xf32>
    %74 = arith.truncf %73 : vector<16x8xf32> to vector<16x8xbf16>
    %c0_23 = arith.constant 0 : index
    %c16 = arith.constant 16 : index
    %c0_24 = arith.constant 0 : index
    %75 = vector.load %arg4[%c0_23, %c16, %c0_24] : memref<2x32x32xbf16, #tpu.memory_space<vmem>>, vector<1x8x32xbf16>
    %76 = vector.shape_cast %75 : vector<1x8x32xbf16> to vector<8x32xbf16>
    %cst_25 = arith.constant dense<0.000000e+00> : vector<16x32xf32>
    %77 = tpu.matmul %74, %76, %cst_25 {dimension_numbers = #tpu.dot_dimension_numbers<[1], [0], [0], [1], [0, 0, 1, 1], [], []>} : vector<16x8xbf16>, vector<8x32xbf16>, vector<16x32xf32> -> vector<16x32xf32>
    %78 = arith.addf %71, %77 : vector<16x32xf32>
    %79 = vector.extract_strided_slice %56 {offsets = [3, 0, 0], sizes = [1, 16, 8], strides = [1, 1, 1]} : vector<4x16x8xf32> to vector<1x16x8xf32>
    %80 = vector.shape_cast %79 : vector<1x16x8xf32> to vector<16x8xf32>
    %81 = arith.truncf %80 : vector<16x8xf32> to vector<16x8xbf16>
    %c0_26 = arith.constant 0 : index
    %c24 = arith.constant 24 : index
    %c0_27 = arith.constant 0 : index
    %82 = vector.load %arg4[%c0_26, %c24, %c0_27] : memref<2x32x32xbf16, #tpu.memory_space<vmem>>, vector<1x8x32xbf16>
    %83 = vector.shape_cast %82 : vector<1x8x32xbf16> to vector<8x32xbf16>
    %cst_28 = arith.constant dense<0.000000e+00> : vector<16x32xf32>
    %84 = tpu.matmul %81, %83, %cst_28 {dimension_numbers = #tpu.dot_dimension_numbers<[1], [0], [0], [1], [0, 0, 1, 1], [], []>} : vector<16x8xbf16>, vector<8x32xbf16>, vector<16x32xf32> -> vector<16x32xf32>
    %85 = arith.addf %78, %84 : vector<16x32xf32>
    %86 = arith.addf %5, %85 : vector<16x32xf32>
    %cst_29 = arith.constant dense<0.000000e+00> : vector<16xf32>
    %87 = vector.multi_reduction <add>, %86, %cst_29 [1] : vector<16x32xf32> to vector<16xf32>
    %88 = vector.shape_cast %87 : vector<16xf32> to vector<16x1xf32>
    %cst_30 = arith.constant 3.200000e+01 : f32
    %89 = vector.broadcast %cst_30 : f32 to vector<16x1xf32>
    %90 = arith.divf %88, %89 : vector<16x1xf32>
    %91 = vector.broadcast %90 : vector<16x1xf32> to vector<16x32xf32>
    %92 = arith.subf %86, %91 : vector<16x32xf32>
    %93 = arith.mulf %92, %92 : vector<16x32xf32>
    %cst_31 = arith.constant dense<0.000000e+00> : vector<16xf32>
    %94 = vector.multi_reduction <add>, %93, %cst_31 [1] : vector<16x32xf32> to vector<16xf32>
    %95 = vector.shape_cast %94 : vector<16xf32> to vector<16x1xf32>
    %cst_32 = arith.constant 3.200000e+01 : f32
    %96 = vector.broadcast %cst_32 : f32 to vector<16x1xf32>
    %97 = arith.divf %95, %96 : vector<16x1xf32>
    %98 = vector.broadcast %90 : vector<16x1xf32> to vector<16x32xf32>
    %99 = arith.subf %86, %98 : vector<16x32xf32>
    %cst_33 = arith.constant 9.99999974E-6 : f32
    %100 = vector.broadcast %cst_33 : f32 to vector<16x1xf32>
    %101 = arith.addf %97, %100 : vector<16x1xf32>
    %102 = math.rsqrt %101 : vector<16x1xf32>
    %103 = vector.broadcast %102 : vector<16x1xf32> to vector<16x32xf32>
    %104 = arith.mulf %99, %103 : vector<16x32xf32>
    %105 = vector.broadcast %11 : vector<1x32xf32> to vector<16x32xf32>
    %106 = arith.mulf %104, %105 : vector<16x32xf32>
    %107 = vector.broadcast %12 : vector<1x32xf32> to vector<16x32xf32>
    %108 = arith.addf %106, %107 : vector<16x32xf32>
    %109 = arith.truncf %108 : vector<16x32xf32> to vector<16x32xbf16>
    %c0_34 = arith.constant 0 : index
    %c0_35 = arith.constant 0 : index
    %c0_36 = arith.constant 0 : index
    %110 = vector.load %arg5[%c0_34, %c0_35, %c0_36] : memref<2x32x64xbf16, #tpu.memory_space<vmem>>, vector<1x32x64xbf16>
    %111 = vector.shape_cast %110 : vector<1x32x64xbf16> to vector<32x64xbf16>
    %cst_37 = arith.constant dense<0.000000e+00> : vector<16x64xf32>
    %112 = tpu.matmul %109, %111, %cst_37 {dimension_numbers = #tpu.dot_dimension_numbers<[1], [0], [0], [1], [0, 0, 1, 1], [], []>} : vector<16x32xbf16>, vector<32x64xbf16>, vector<16x64xf32> -> vector<16x64xf32>
    %113 = vector.broadcast %9 : vector<1x64xf32> to vector<16x64xf32>
    %114 = arith.addf %112, %113 : vector<16x64xf32>
    %cst_38 = arith.constant 0.000000e+00 : f32
    %115 = vector.broadcast %cst_38 : f32 to vector<16x64xf32>
    %116 = arith.maximumf %114, %115 : vector<16x64xf32>
    %117 = arith.truncf %116 : vector<16x64xf32> to vector<16x64xbf16>
    %c0_39 = arith.constant 0 : index
    %c0_40 = arith.constant 0 : index
    %c0_41 = arith.constant 0 : index
    %118 = vector.load %arg6[%c0_39, %c0_40, %c0_41] : memref<2x64x32xbf16, #tpu.memory_space<vmem>>, vector<1x64x32xbf16>
    %119 = vector.shape_cast %118 : vector<1x64x32xbf16> to vector<64x32xbf16>
    %cst_42 = arith.constant dense<0.000000e+00> : vector<16x32xf32>
    %120 = tpu.matmul %117, %119, %cst_42 {dimension_numbers = #tpu.dot_dimension_numbers<[1], [0], [0], [1], [0, 0, 1, 1], [], []>} : vector<16x64xbf16>, vector<64x32xbf16>, vector<16x32xf32> -> vector<16x32xf32>
    %121 = vector.broadcast %15 : vector<1x32xf32> to vector<16x32xf32>
    %122 = arith.addf %120, %121 : vector<16x32xf32>
    %123 = arith.addf %108, %122 : vector<16x32xf32>
    %cst_43 = arith.constant dense<0.000000e+00> : vector<16xf32>
    %124 = vector.multi_reduction <add>, %123, %cst_43 [1] : vector<16x32xf32> to vector<16xf32>
    %125 = vector.shape_cast %124 : vector<16xf32> to vector<16x1xf32>
    %cst_44 = arith.constant 3.200000e+01 : f32
    %126 = vector.broadcast %cst_44 : f32 to vector<16x1xf32>
    %127 = arith.divf %125, %126 : vector<16x1xf32>
    %128 = vector.broadcast %127 : vector<16x1xf32> to vector<16x32xf32>
    %129 = arith.subf %123, %128 : vector<16x32xf32>
    %130 = arith.mulf %129, %129 : vector<16x32xf32>
    %cst_45 = arith.constant dense<0.000000e+00> : vector<16xf32>
    %131 = vector.multi_reduction <add>, %130, %cst_45 [1] : vector<16x32xf32> to vector<16xf32>
    %132 = vector.shape_cast %131 : vector<16xf32> to vector<16x1xf32>
    %cst_46 = arith.constant 3.200000e+01 : f32
    %133 = vector.broadcast %cst_46 : f32 to vector<16x1xf32>
    %134 = arith.divf %132, %133 : vector<16x1xf32>
    %135 = vector.broadcast %127 : vector<16x1xf32> to vector<16x32xf32>
    %136 = arith.subf %123, %135 : vector<16x32xf32>
    %cst_47 = arith.constant 9.99999974E-6 : f32
    %137 = vector.broadcast %cst_47 : f32 to vector<16x1xf32>
    %138 = arith.addf %134, %137 : vector<16x1xf32>
    %139 = math.rsqrt %138 : vector<16x1xf32>
    %140 = vector.broadcast %139 : vector<16x1xf32> to vector<16x32xf32>
    %141 = arith.mulf %136, %140 : vector<16x32xf32>
    %142 = vector.broadcast %13 : vector<1x32xf32> to vector<16x32xf32>
    %143 = arith.mulf %141, %142 : vector<16x32xf32>
    %144 = vector.broadcast %14 : vector<1x32xf32> to vector<16x32xf32>
    %145 = arith.addf %143, %144 : vector<16x32xf32>
    %c1 = arith.constant 1 : index
    %c0_48 = arith.constant 0 : index
    %c0_49 = arith.constant 0 : index
    %146 = vector.load %arg7[%c1, %c0_48, %c0_49] : memref<2x8x96xf32, #tpu.memory_space<vmem>>, vector<1x8x96xf32>
    %147 = vector.shape_cast %146 : vector<1x8x96xf32> to vector<8x96xf32>
    %148 = vector.extract_strided_slice %147 {offsets = [0, 0], sizes = [1, 96], strides = [1, 1]} : vector<8x96xf32> to vector<1x96xf32>
    %149 = vector.extract_strided_slice %147 {offsets = [1, 0], sizes = [1, 64], strides = [1, 1]} : vector<8x96xf32> to vector<1x64xf32>
    %150 = vector.extract_strided_slice %147 {offsets = [2, 0], sizes = [1, 32], strides = [1, 1]} : vector<8x96xf32> to vector<1x32xf32>
    %151 = vector.extract_strided_slice %147 {offsets = [3, 0], sizes = [1, 32], strides = [1, 1]} : vector<8x96xf32> to vector<1x32xf32>
    %152 = vector.extract_strided_slice %147 {offsets = [4, 0], sizes = [1, 32], strides = [1, 1]} : vector<8x96xf32> to vector<1x32xf32>
    %153 = vector.extract_strided_slice %147 {offsets = [5, 0], sizes = [1, 32], strides = [1, 1]} : vector<8x96xf32> to vector<1x32xf32>
    %154 = vector.extract_strided_slice %147 {offsets = [6, 0], sizes = [1, 32], strides = [1, 1]} : vector<8x96xf32> to vector<1x32xf32>
    %155 = vector.extract_strided_slice %147 {offsets = [7, 0], sizes = [1, 32], strides = [1, 1]} : vector<8x96xf32> to vector<1x32xf32>
    %156 = arith.truncf %145 : vector<16x32xf32> to vector<16x32xbf16>
    %c1_50 = arith.constant 1 : index
    %c0_51 = arith.constant 0 : index
    %c0_52 = arith.constant 0 : index
    %157 = vector.load %arg3[%c1_50, %c0_51, %c0_52] : memref<2x32x96xbf16, #tpu.memory_space<vmem>>, vector<1x32x96xbf16>
    %158 = vector.shape_cast %157 : vector<1x32x96xbf16> to vector<32x96xbf16>
    %cst_53 = arith.constant dense<0.000000e+00> : vector<16x96xf32>
    %159 = tpu.matmul %156, %158, %cst_53 {dimension_numbers = #tpu.dot_dimension_numbers<[1], [0], [0], [1], [0, 0, 1, 1], [], []>} : vector<16x32xbf16>, vector<32x96xbf16>, vector<16x96xf32> -> vector<16x96xf32>
    %160 = vector.broadcast %148 : vector<1x96xf32> to vector<16x96xf32>
    %161 = arith.addf %159, %160 : vector<16x96xf32>
    %162 = vector.extract_strided_slice %161 {offsets = [0, 0], sizes = [16, 8], strides = [1, 1]} : vector<16x96xf32> to vector<16x8xf32>
    %163 = vector.extract_strided_slice %161 {offsets = [0, 8], sizes = [16, 8], strides = [1, 1]} : vector<16x96xf32> to vector<16x8xf32>
    %164 = vector.extract_strided_slice %161 {offsets = [0, 16], sizes = [16, 8], strides = [1, 1]} : vector<16x96xf32> to vector<16x8xf32>
    %165 = vector.extract_strided_slice %161 {offsets = [0, 24], sizes = [16, 8], strides = [1, 1]} : vector<16x96xf32> to vector<16x8xf32>
    %166 = tpu.concatenate %162, %163, %164, %165 in 0 : vector<16x8xf32>, vector<16x8xf32>, vector<16x8xf32>, vector<16x8xf32> -> vector<64x8xf32>
    %167 = vector.shape_cast %166 : vector<64x8xf32> to vector<8x8x8xf32>
    %168 = arith.truncf %167 : vector<8x8x8xf32> to vector<8x8x8xbf16>
    %169 = vector.extract_strided_slice %161 {offsets = [0, 32], sizes = [16, 8], strides = [1, 1]} : vector<16x96xf32> to vector<16x8xf32>
    %170 = vector.extract_strided_slice %161 {offsets = [0, 40], sizes = [16, 8], strides = [1, 1]} : vector<16x96xf32> to vector<16x8xf32>
    %171 = vector.extract_strided_slice %161 {offsets = [0, 48], sizes = [16, 8], strides = [1, 1]} : vector<16x96xf32> to vector<16x8xf32>
    %172 = vector.extract_strided_slice %161 {offsets = [0, 56], sizes = [16, 8], strides = [1, 1]} : vector<16x96xf32> to vector<16x8xf32>
    %173 = tpu.concatenate %169, %170, %171, %172 in 0 : vector<16x8xf32>, vector<16x8xf32>, vector<16x8xf32>, vector<16x8xf32> -> vector<64x8xf32>
    %174 = vector.shape_cast %173 : vector<64x8xf32> to vector<8x8x8xf32>
    %175 = arith.truncf %174 : vector<8x8x8xf32> to vector<8x8x8xbf16>
    %176 = vector.extract_strided_slice %161 {offsets = [0, 64], sizes = [16, 8], strides = [1, 1]} : vector<16x96xf32> to vector<16x8xf32>
    %177 = vector.extract_strided_slice %161 {offsets = [0, 72], sizes = [16, 8], strides = [1, 1]} : vector<16x96xf32> to vector<16x8xf32>
    %178 = vector.extract_strided_slice %161 {offsets = [0, 80], sizes = [16, 8], strides = [1, 1]} : vector<16x96xf32> to vector<16x8xf32>
    %179 = vector.extract_strided_slice %161 {offsets = [0, 88], sizes = [16, 8], strides = [1, 1]} : vector<16x96xf32> to vector<16x8xf32>
    %180 = tpu.concatenate %176, %177, %178, %179 in 0 : vector<16x8xf32>, vector<16x8xf32>, vector<16x8xf32>, vector<16x8xf32> -> vector<64x8xf32>
    %181 = vector.shape_cast %180 : vector<64x8xf32> to vector<8x8x8xf32>
    %182 = arith.truncf %181 : vector<8x8x8xf32> to vector<8x8x8xbf16>
    "tpu.trace_start"() <{level = 10 : i32, message = "bqe,bke->bqk"}> : () -> ()
    %cst_54 = arith.constant dense<0.000000e+00> : vector<8x8x8xf32>
    %183 = tpu.matmul %168, %175, %cst_54 {dimension_numbers = #tpu.dot_dimension_numbers<[2], [2], [1], [1], [0, 0, 0, 1, 1, 1], [0], [0]>} : vector<8x8x8xbf16>, vector<8x8x8xbf16>, vector<8x8x8xf32> -> vector<8x8x8xf32>
    "tpu.trace_stop"() : () -> ()
    %cst_55 = arith.constant dense<0xFF800000> : vector<8x8xf32>
    %184 = vector.multi_reduction <maximumf>, %183, %cst_55 [2] : vector<8x8x8xf32> to vector<8x8xf32>
    %185 = vector.shape_cast %184 : vector<8x8xf32> to vector<8x8x1xf32>
    %186 = vector.broadcast %185 : vector<8x8x1xf32> to vector<8x8x8xf32>
    %187 = arith.subf %183, %186 : vector<8x8x8xf32>
    %188 = math.exp %187 : vector<8x8x8xf32>
    %cst_56 = arith.constant dense<0.000000e+00> : vector<8x8xf32>
    %189 = vector.multi_reduction <add>, %188, %cst_56 [2] : vector<8x8x8xf32> to vector<8x8xf32>
    %190 = vector.shape_cast %189 : vector<8x8xf32> to vector<8x8x1xf32>
    %191 = tpu.reciprocal %190 {approx = true} : vector<8x8x1xf32> -> vector<8x8x1xf32>
    %192 = vector.broadcast %191 : vector<8x8x1xf32> to vector<8x8x8xf32>
    %193 = arith.mulf %188, %192 : vector<8x8x8xf32>
    %194 = arith.truncf %193 : vector<8x8x8xf32> to vector<8x8x8xbf16>
    "tpu.trace_start"() <{level = 10 : i32, message = "bqk,bke->bqe"}> : () -> ()
    %cst_57 = arith.constant dense<0.000000e+00> : vector<8x8x8xf32>
    %195 = tpu.matmul %194, %182, %cst_57 {dimension_numbers = #tpu.dot_dimension_numbers<[2], [1], [1], [2], [0, 0, 0, 1, 1, 2], [0], [0]>} : vector<8x8x8xbf16>, vector<8x8x8xbf16>, vector<8x8x8xf32> -> vector<8x8x8xf32>
    "tpu.trace_stop"() : () -> ()
    %196 = vector.shape_cast %195 : vector<8x8x8xf32> to vector<4x16x8xf32>
    %197 = vector.extract_strided_slice %196 {offsets = [0, 0, 0], sizes = [1, 16, 8], strides = [1, 1, 1]} : vector<4x16x8xf32> to vector<1x16x8xf32>
    %198 = vector.shape_cast %197 : vector<1x16x8xf32> to vector<16x8xf32>
    %199 = arith.truncf %198 : vector<16x8xf32> to vector<16x8xbf16>
    %c1_58 = arith.constant 1 : index
    %c0_59 = arith.constant 0 : index
    %c0_60 = arith.constant 0 : index
    %200 = vector.load %arg4[%c1_58, %c0_59, %c0_60] : memref<2x32x32xbf16, #tpu.memory_space<vmem>>, vector<1x8x32xbf16>
    %201 = vector.shape_cast %200 : vector<1x8x32xbf16> to vector<8x32xbf16>
    %cst_61 = arith.constant dense<0.000000e+00> : vector<16x32xf32>
    %202 = tpu.matmul %199, %201, %cst_61 {dimension_numbers = #tpu.dot_dimension_numbers<[1], [0], [0], [1], [0, 0, 1, 1], [], []>} : vector<16x8xbf16>, vector<8x32xbf16>, vector<16x32xf32> -> vector<16x32xf32>
    %203 = vector.broadcast %150 : vector<1x32xf32> to vector<16x32xf32>
    %204 = arith.addf %203, %202 : vector<16x32xf32>
    %205 = vector.extract_strided_slice %196 {offsets = [1, 0, 0], sizes = [1, 16, 8], strides = [1, 1, 1]} : vector<4x16x8xf32> to vector<1x16x8xf32>
    %206 = vector.shape_cast %205 : vector<1x16x8xf32> to vector<16x8xf32>
    %207 = arith.truncf %206 : vector<16x8xf32> to vector<16x8xbf16>
    %c1_62 = arith.constant 1 : index
    %c8_63 = arith.constant 8 : index
    %c0_64 = arith.constant 0 : index
    %208 = vector.load %arg4[%c1_62, %c8_63, %c0_64] : memref<2x32x32xbf16, #tpu.memory_space<vmem>>, vector<1x8x32xbf16>
    %209 = vector.shape_cast %208 : vector<1x8x32xbf16> to vector<8x32xbf16>
    %cst_65 = arith.constant dense<0.000000e+00> : vector<16x32xf32>
    %210 = tpu.matmul %207, %209, %cst_65 {dimension_numbers = #tpu.dot_dimension_numbers<[1], [0], [0], [1], [0, 0, 1, 1], [], []>} : vector<16x8xbf16>, vector<8x32xbf16>, vector<16x32xf32> -> vector<16x32xf32>
    %211 = arith.addf %204, %210 : vector<16x32xf32>
    %212 = vector.extract_strided_slice %196 {offsets = [2, 0, 0], sizes = [1, 16, 8], strides = [1, 1, 1]} : vector<4x16x8xf32> to vector<1x16x8xf32>
    %213 = vector.shape_cast %212 : vector<1x16x8xf32> to vector<16x8xf32>
    %214 = arith.truncf %213 : vector<16x8xf32> to vector<16x8xbf16>
    %c1_66 = arith.constant 1 : index
    %c16_67 = arith.constant 16 : index
    %c0_68 = arith.constant 0 : index
    %215 = vector.load %arg4[%c1_66, %c16_67, %c0_68] : memref<2x32x32xbf16, #tpu.memory_space<vmem>>, vector<1x8x32xbf16>
    %216 = vector.shape_cast %215 : vector<1x8x32xbf16> to vector<8x32xbf16>
    %cst_69 = arith.constant dense<0.000000e+00> : vector<16x32xf32>
    %217 = tpu.matmul %214, %216, %cst_69 {dimension_numbers = #tpu.dot_dimension_numbers<[1], [0], [0], [1], [0, 0, 1, 1], [], []>} : vector<16x8xbf16>, vector<8x32xbf16>, vector<16x32xf32> -> vector<16x32xf32>
    %218 = arith.addf %211, %217 : vector<16x32xf32>
    %219 = vector.extract_strided_slice %196 {offsets = [3, 0, 0], sizes = [1, 16, 8], strides = [1, 1, 1]} : vector<4x16x8xf32> to vector<1x16x8xf32>
    %220 = vector.shape_cast %219 : vector<1x16x8xf32> to vector<16x8xf32>
    %221 = arith.truncf %220 : vector<16x8xf32> to vector<16x8xbf16>
    %c1_70 = arith.constant 1 : index
    %c24_71 = arith.constant 24 : index
    %c0_72 = arith.constant 0 : index
    %222 = vector.load %arg4[%c1_70, %c24_71, %c0_72] : memref<2x32x32xbf16, #tpu.memory_space<vmem>>, vector<1x8x32xbf16>
    %223 = vector.shape_cast %222 : vector<1x8x32xbf16> to vector<8x32xbf16>
    %cst_73 = arith.constant dense<0.000000e+00> : vector<16x32xf32>
    %224 = tpu.matmul %221, %223, %cst_73 {dimension_numbers = #tpu.dot_dimension_numbers<[1], [0], [0], [1], [0, 0, 1, 1], [], []>} : vector<16x8xbf16>, vector<8x32xbf16>, vector<16x32xf32> -> vector<16x32xf32>
    %225 = arith.addf %218, %224 : vector<16x32xf32>
    %226 = arith.addf %145, %225 : vector<16x32xf32>
    %cst_74 = arith.constant dense<0.000000e+00> : vector<16xf32>
    %227 = vector.multi_reduction <add>, %226, %cst_74 [1] : vector<16x32xf32> to vector<16xf32>
    %228 = vector.shape_cast %227 : vector<16xf32> to vector<16x1xf32>
    %cst_75 = arith.constant 3.200000e+01 : f32
    %229 = vector.broadcast %cst_75 : f32 to vector<16x1xf32>
    %230 = arith.divf %228, %229 : vector<16x1xf32>
    %231 = vector.broadcast %230 : vector<16x1xf32> to vector<16x32xf32>
    %232 = arith.subf %226, %231 : vector<16x32xf32>
    %233 = arith.mulf %232, %232 : vector<16x32xf32>
    %cst_76 = arith.constant dense<0.000000e+00> : vector<16xf32>
    %234 = vector.multi_reduction <add>, %233, %cst_76 [1] : vector<16x32xf32> to vector<16xf32>
    %235 = vector.shape_cast %234 : vector<16xf32> to vector<16x1xf32>
    %cst_77 = arith.constant 3.200000e+01 : f32
    %236 = vector.broadcast %cst_77 : f32 to vector<16x1xf32>
    %237 = arith.divf %235, %236 : vector<16x1xf32>
    %238 = vector.broadcast %230 : vector<16x1xf32> to vector<16x32xf32>
    %239 = arith.subf %226, %238 : vector<16x32xf32>
    %cst_78 = arith.constant 9.99999974E-6 : f32
    %240 = vector.broadcast %cst_78 : f32 to vector<16x1xf32>
    %241 = arith.addf %237, %240 : vector<16x1xf32>
    %242 = math.rsqrt %241 : vector<16x1xf32>
    %243 = vector.broadcast %242 : vector<16x1xf32> to vector<16x32xf32>
    %244 = arith.mulf %239, %243 : vector<16x32xf32>
    %245 = vector.broadcast %151 : vector<1x32xf32> to vector<16x32xf32>
    %246 = arith.mulf %244, %245 : vector<16x32xf32>
    %247 = vector.broadcast %152 : vector<1x32xf32> to vector<16x32xf32>
    %248 = arith.addf %246, %247 : vector<16x32xf32>
    %249 = arith.truncf %248 : vector<16x32xf32> to vector<16x32xbf16>
    %c1_79 = arith.constant 1 : index
    %c0_80 = arith.constant 0 : index
    %c0_81 = arith.constant 0 : index
    %250 = vector.load %arg5[%c1_79, %c0_80, %c0_81] : memref<2x32x64xbf16, #tpu.memory_space<vmem>>, vector<1x32x64xbf16>
    %251 = vector.shape_cast %250 : vector<1x32x64xbf16> to vector<32x64xbf16>
    %cst_82 = arith.constant dense<0.000000e+00> : vector<16x64xf32>
    %252 = tpu.matmul %249, %251, %cst_82 {dimension_numbers = #tpu.dot_dimension_numbers<[1], [0], [0], [1], [0, 0, 1, 1], [], []>} : vector<16x32xbf16>, vector<32x64xbf16>, vector<16x64xf32> -> vector<16x64xf32>
    %253 = vector.broadcast %149 : vector<1x64xf32> to vector<16x64xf32>
    %254 = arith.addf %252, %253 : vector<16x64xf32>
    %cst_83 = arith.constant 0.000000e+00 : f32
    %255 = vector.broadcast %cst_83 : f32 to vector<16x64xf32>
    %256 = arith.maximumf %254, %255 : vector<16x64xf32>
    %257 = arith.truncf %256 : vector<16x64xf32> to vector<16x64xbf16>
    %c1_84 = arith.constant 1 : index
    %c0_85 = arith.constant 0 : index
    %c0_86 = arith.constant 0 : index
    %258 = vector.load %arg6[%c1_84, %c0_85, %c0_86] : memref<2x64x32xbf16, #tpu.memory_space<vmem>>, vector<1x64x32xbf16>
    %259 = vector.shape_cast %258 : vector<1x64x32xbf16> to vector<64x32xbf16>
    %cst_87 = arith.constant dense<0.000000e+00> : vector<16x32xf32>
    %260 = tpu.matmul %257, %259, %cst_87 {dimension_numbers = #tpu.dot_dimension_numbers<[1], [0], [0], [1], [0, 0, 1, 1], [], []>} : vector<16x64xbf16>, vector<64x32xbf16>, vector<16x32xf32> -> vector<16x32xf32>
    %261 = vector.broadcast %155 : vector<1x32xf32> to vector<16x32xf32>
    %262 = arith.addf %260, %261 : vector<16x32xf32>
    %263 = arith.addf %248, %262 : vector<16x32xf32>
    %cst_88 = arith.constant dense<0.000000e+00> : vector<16xf32>
    %264 = vector.multi_reduction <add>, %263, %cst_88 [1] : vector<16x32xf32> to vector<16xf32>
    %265 = vector.shape_cast %264 : vector<16xf32> to vector<16x1xf32>
    %cst_89 = arith.constant 3.200000e+01 : f32
    %266 = vector.broadcast %cst_89 : f32 to vector<16x1xf32>
    %267 = arith.divf %265, %266 : vector<16x1xf32>
    %268 = vector.broadcast %267 : vector<16x1xf32> to vector<16x32xf32>
    %269 = arith.subf %263, %268 : vector<16x32xf32>
    %270 = arith.mulf %269, %269 : vector<16x32xf32>
    %cst_90 = arith.constant dense<0.000000e+00> : vector<16xf32>
    %271 = vector.multi_reduction <add>, %270, %cst_90 [1] : vector<16x32xf32> to vector<16xf32>
    %272 = vector.shape_cast %271 : vector<16xf32> to vector<16x1xf32>
    %cst_91 = arith.constant 3.200000e+01 : f32
    %273 = vector.broadcast %cst_91 : f32 to vector<16x1xf32>
    %274 = arith.divf %272, %273 : vector<16x1xf32>
    %275 = vector.broadcast %267 : vector<16x1xf32> to vector<16x32xf32>
    %276 = arith.subf %263, %275 : vector<16x32xf32>
    %cst_92 = arith.constant 9.99999974E-6 : f32
    %277 = vector.broadcast %cst_92 : f32 to vector<16x1xf32>
    %278 = arith.addf %274, %277 : vector<16x1xf32>
    %279 = math.rsqrt %278 : vector<16x1xf32>
    %280 = vector.broadcast %279 : vector<16x1xf32> to vector<16x32xf32>
    %281 = arith.mulf %276, %280 : vector<16x32xf32>
    %282 = vector.broadcast %153 : vector<1x32xf32> to vector<16x32xf32>
    %283 = arith.mulf %281, %282 : vector<16x32xf32>
    %284 = vector.broadcast %154 : vector<1x32xf32> to vector<16x32xf32>
    %285 = arith.addf %283, %284 : vector<16x32xf32>
    %286 = vector.shape_cast %285 : vector<16x32xf32> to vector<2x8x32xf32>
    %287 = vector.extract_strided_slice %286 {offsets = [0, 0, 0], sizes = [2, 1, 32], strides = [1, 1, 1]} : vector<2x8x32xf32> to vector<2x1x32xf32>
    %288 = vector.shape_cast %287 : vector<2x1x32xf32> to vector<2x32xf32>
    %c0_93 = arith.constant 0 : index
    %c0_94 = arith.constant 0 : index
    %289 = vector.load %arg8[%c0_93, %c0_94] : memref<33x1xf32, #tpu.memory_space<vmem>>, vector<32x1xf32>
    %cst_95 = arith.constant dense<0.000000e+00> : vector<2x1xf32>
    %290 = tpu.matmul %288, %289, %cst_95 {dimension_numbers = #tpu.dot_dimension_numbers<[1], [0], [0], [1], [0, 0, 1, 1], [], []>} : vector<2x32xf32>, vector<32x1xf32>, vector<2x1xf32> -> vector<2x1xf32>
    %c32 = arith.constant 32 : index
    %c0_96 = arith.constant 0 : index
    %291 = vector.load %arg8[%c32, %c0_96] : memref<33x1xf32, #tpu.memory_space<vmem>>, vector<1x1xf32>
    %292 = vector.broadcast %291 : vector<1x1xf32> to vector<2x1xf32>
    %293 = arith.addf %290, %292 : vector<2x1xf32>
    %c0_97 = arith.constant 0 : index
    %c0_98 = arith.constant 0 : index
    %294 = vector.load %arg9[%c0_97, %c0_98] : memref<2x1xf32, #tpu.memory_space<vmem>>, vector<2x1xf32>
    tpu.vector_store %arg9[%c0_97, %c0_98], %293 {strides = array<i32>} : memref<2x1xf32, #tpu.memory_space<vmem>>, vector<2x1xf32>,
    return
  }
}

</mosaic_0001>

<bundles_post_ra>
// kernel: tpu_custom_call.1
= control target key start
LH: loop header
LB: loop body
LE: loop exit
PB: predicated region body
PF: predicated region fallthrough
CT: control target
= control target key end

     0   :  { %14 = vsyncpa [#allocation3], 0  ;;  %s3671_s30 = smov [#allocation2]   ;;  %s4377_s0 = inlined_call_operand.vmem [shape: f32[16,4], index: 0, kind: input, shape index: {}]   ;;  %s4378_s1 = inlined_call_operand.vmem [shape: f32[16,32], index: 1, kind: input, shape index: {}]   ;;  %s4379_s2 = inlined_call_operand.hbm [shape: bf16[4,32], index: 2, kind: input, shape index: {}]   ;;  %s4380_s3 = inlined_call_operand.vmem [shape: bf16[2,32,96], index: 3, kind: input, shape index: {}]   ;;  %s4381_s4 = inlined_call_operand.vmem [shape: bf16[2,32,32], index: 4, kind: input, shape index: {}]   ;;  %s4382_s5 = inlined_call_operand.vmem [shape: bf16[2,32,64], index: 5, kind: input, shape index: {}]   ;;  %s4383_s6 = inlined_call_operand.vmem [shape: bf16[2,64,32], index: 6, kind: input, shape index: {}]   ;;  %s4384_s7 = inlined_call_operand.vmem [shape: f32[2,8,96], index: 7, kind: input, shape index: {}]   ;;  %s4385_s8 = inlined_call_operand.vmem [shape: f32[33,1], index: 8, kind: input, shape index: {}]   ;;  %s4386_s9 = inlined_call_operand.vmem [shape: f32[2,1], index: 9, kind: output, shape index: {}]  }
   0x1   :  { %s25_s10 = sshll.u32 %s3671_s30, 4  ;;  %s26_s10 = int_to_ptr.vmem [resolvable:$true] %s25_s10 }
   0x2   :  { %s3657_s11 = scalar_lea.vmem %s26_s10, 32  ;;  %p3662_p1 = scmp.lt.s32.totalorder %s26_s10, %s26_s10 }
   0x3   :  { %p3658_p0 = scmp.ne.s32.totalorder %s26_s10, %s3657_s11  ;;  %p3663_p2 = scmp.lt.s32.totalorder %s3657_s11, %s3657_s11 }
   0x5   :  { %p3664_p3 = por %p3663_p2, %p3662_p1 }
   0x7   :  { %p3665_p4 = pnand %p3664_p3, %p3658_p0 }
   0x9   :  { %3668 = shalt.err (!%p3665_p4)
}
   0xa   :  { %28 = dma.hbm_to_vmem [thread:$0]  %s4379_s2, 32, %s26_s10, [#allocation3]  }
   0xb   :  { %3669 = dma.done.wait [#allocation3], 32  }
   0xc   :  { %3670 = vsyncadd [#allocation3], 4294967264  ;;  %v3672_v0 = vmov 0.0   ;;  %vm3673_vm0 = vmmov 0   ;;  %vm55_vm1 = vcmask 1041408   ;;  %v45_v2 = vld [vmem:[%s4377_s0] sm:$0xff]  ;;  %v106_v17 = vlaneseq }
   0xd   :  { %3202 = vmatprep.subr.bf16.mxu0 %v3672_v0  ;;  %3204 = vmatprep.mubr.msk.bf16.mxu0 %vm3673_vm0, %v3672_v0  ;;  %v48_v1 = vld [vmem:[#allocation2] sm:$0x3]  ;;  %v46_v3 = vld [vmem:[%s4377_s0 + $0x8] sm:$0xff]  ;;  %vm51_vm2 = vcmask 31744   ;;  %vm122_vm3 = vcmask 261120   ;;  %s3674_s25 = smov 104  }
   0xe   :  { %3208 = vmatprep.subr.bf16.mxu1 %v3672_v0  ;;  %3212 = vmatprep.mubr.msk.bf16.mxu1 %vm3673_vm0, %v3672_v0  ;;  %v57_v4 = vsel %vm55_vm1, %v48_v1, 0  ;;  %v47_v5 = vpack.c.bf16 %v46_v3, %v45_v2  ;;  %v3553_v6 = vld [vmem:[%s4380_s3 + $0x8] sm:$0xff]   ;;  %v3554_v7 = vld [vmem:[%s4380_s3] sm:$0xff]   ;;  %v3770_v18 = vshrl.u32 %v106_v17, 7  ;;  %s3675_s26 = smov 120   ;;  %s3676_s27 = smov 96  }
   0xf   :  { %3203 = vmatpush3.bf16.msra.mxu0 %v57_v4  ;;  %3209 = vmatpush3.bf16.msra.mxu1 %v3553_v6  ;;  %v49_v9 = vld [vmem:[%s4378_s1] sm:$0xff]  ;;  %v50_v11 = vld [vmem:[%s4378_s1 + $0x8] sm:$0xff]  ;;  %s3677_s28 = smov 112   ;;  %vm198_vm4 = vcmask 64512   ;;  %s3678_s29 = smov 64   ;;  %vm689_vm5 = vcmask 1043456  }
  0x10   :  { %3216 = vmatprep.subr.bf16.mxu0 %v3672_v0  ;;  %3210 = vmatprep.subr.bf16.mxu1 %v3672_v0  ;;  %v108_v19 = vsub.s32 0, %v3770_v18  ;;  %v3776_v20 = vld [vmem:[%s4384_s7] sm:$0xff]  ;;  %vm1422_vm6 = vcmask 523264   ;;  %vm2926_vm7 = vcmask 1041409   ;;  %vm3000_vm8 = vcmask 1024  }
  0x12   :  { %3205 = vmatmul.mubr.msk.bf16.vlgmr.msra.gmra.mxu0 %vm51_vm2, %v47_v5  ;;  %v109_v22 = vrot.slane %v3776_v20, %v108_v19 }
  0x13   :  { %3218 = vmatprep.mubr.msk.bf16.mxu0 %vm3673_vm0, %v3672_v0  ;;  %3211 = vmatpush3.bf16.msra.mxu1 %v3554_v7 }
  0x14   :  { %3222 = vmatprep.subr.bf16.mxu1 %v3672_v0 }
  0xd2   :  { %v93_v8 = vpop.f32.mrf.mxu0 }
  0xd3   :  { %v3761_v13 = vadd.f32 %v93_v8, %v49_v9 }
  0xd4   :  { %v3206_v10 = vpop.f32.mrf.mxu0 }
  0xd6   :  { %v96_v12 = vpop.f32.mrf.mxu0 }
  0xd7   :  { %v3763_v14 = vadd.f32 %v96_v12, %v50_v11 }
  0xd8   :  { %v3207_v15 = vpop.f32.mrf.mxu0 }
  0xd9   :  { %v101_v16 = vpack.c.bf16 %v3763_v14, %v3761_v13 }
  0xdb   :  { %3213 = vmatmul.mubr.msk.bf16.vlgmr.msra.gmra.mxu1 %vm122_vm3, %v101_v16 }
  0xdc   :  { %3224 = vmatprep.mubr.msk.bf16.mxu1 %vm3673_vm0, %v3672_v0 }
 0x19b   :  { %v160_v21 = vpop.f32.mrf.mxu1 }
 0x19c   :  { %v161_v25 = vadd.f32 %v160_v21, %v109_v22 }
 0x19d   :  { %v3214_v23 = vpop.f32.mrf.mxu1 }
 0x19e   :  { %v187_v29 = vpack.c.bf16 %v161_v25, %v161_v25 }
 0x19f   :  { %v163_v24 = vpop.f32.mrf.mxu1 }
 0x1a0   :  { %v164_v26 = vadd.f32 %v163_v24, %v109_v22 }
 0x1a1   :  { %v3215_v27 = vpop.f32.mrf.mxu1 }
 0x1a2   :  { %v3533_v28 = vpack.i.bf16 %v164_v26, %v161_v25  ;;  %v188_v30 = vpack.c.bf16 %v164_v26, %v164_v26 }
 0x1a4   :  { %3534 = vrot.lane.b32.xlu1 %v3533_v28, %s3674_s25  ;;  %3524 = vrot.lane.b32.xlu0 %v3533_v28, %s3675_s26 }
 0x1a8   :  { %196 = vrot.lane.b32.xlu1 %v187_v29, %s3676_s27  ;;  %3529 = vrot.lane.b32.xlu0 %v3533_v28, %s3677_s28 }
 0x1ac   :  { %246 = vrot.lane.b32.xlu0 %v188_v30, %s3676_s27 }
 0x216   :  { %v3535_v31 = vpop.permute.xlu1 %3534  ;;  %v3525_v32 = vpop.permute.xlu0 %3524 }
 0x217   :  { %v3527_v33 = vunpack.i.h.bf16 %v3525_v32  ;;  %v3526_v34 = vunpack.i.l.bf16 %v3525_v32  ;;  %v3536_v42 = vunpack.i.l.bf16 %v3535_v31  ;;  %v3537_v45 = vunpack.i.h.bf16 %v3535_v31 }
 0x219   :  { %v3786_v35 = vpack.c.bf16 %v3527_v33, %v3527_v33  ;;  %v3788_v36 = vpack.c.bf16 %v3526_v34, %v3526_v34  ;;  %v3805_v48 = vpack.c.bf16 %v3536_v42, %v3536_v42  ;;  %v3808_v49 = vpack.c.bf16 %v3537_v45, %v3537_v45 }
 0x21a   :  { %v197_v37 = vpop.permute.xlu1 %196  ;;  %v3530_v38 = vpop.permute.xlu0 %3529 }
 0x21b   :  { %v203_v39 = vsel %vm198_vm4, %v197_v37, 0  ;;  %v3532_v40 = vunpack.i.h.bf16 %v3530_v38  ;;  %v3531_v41 = vunpack.i.l.bf16 %v3530_v38  ;;  %295 = vrot.lane.b32.xlu1 %v3788_v36, %s3676_s27  ;;  %344 = vrot.lane.b32.xlu0 %v3786_v35, %s3676_s27 }
 0x21c   :  { %3217 = vmatpush3.bf16.xpose.msra.mxu0 %v203_v39 }
 0x21d   :  { %v3795_v43 = vpack.c.bf16 %v3532_v40, %v3532_v40  ;;  %v3797_v44 = vpack.c.bf16 %v3531_v41, %v3531_v41  ;;  %3228 = vmatprep.subr.bf16.mxu0 %v3672_v0 }
 0x21e   :  { %v247_v46 = vpop.permute.xlu0 %246 }
 0x21f   :  { %v252_v47 = vsel %vm198_vm4, %v247_v46, 0  ;;  %393 = vrot.lane.b32.xlu1 %v3797_v44, %s3676_s27  ;;  %442 = vrot.lane.b32.xlu0 %v3795_v43, %s3676_s27 }
 0x220   :  { %3223 = vmatpush3.bf16.xpose.msra.mxu1 %v252_v47 }
 0x221   :  { %3234 = vmatprep.subr.bf16.mxu1 %v3672_v0 }
 0x223   :  { %3219 = vmatmul.mubr.msk.bf16.vlgmr.msra.gmra.mxu0 %vm198_vm4, %v187_v29  ;;  %491 = vrot.lane.b32.xlu1 %v3805_v48, %s3676_s27 }
 0x224   :  { %540 = vrot.lane.b32.xlu0 %v3808_v49, %s3676_s27  ;;  %3230 = vmatprep.mubr.msk.bf16.mxu0 %vm3673_vm0, %v3672_v0 }
 0x227   :  { %733 = vrot.lane.b32.xlu1 %v188_v30, %s3678_s29  ;;  %3225 = vmatmul.mubr.msk.bf16.vlgmr.msra.gmra.mxu1 %vm198_vm4, %v188_v30 }
 0x228   :  { %684 = vrot.lane.b32.xlu0 %v187_v29, %s3678_s29  ;;  %3236 = vmatprep.mubr.msk.bf16.mxu1 %vm3673_vm0, %v3672_v0 }
 0x28d   :  { %v296_v50 = vpop.permute.xlu1 %295  ;;  %v345_v51 = vpop.permute.xlu0 %344 }
 0x28e   :  { %v301_v52 = vsel %vm198_vm4, %v296_v50, 0  ;;  %v350_v53 = vsel %vm198_vm4, %v345_v51, 0 }
 0x28f   :  { %3229 = vmatpush3.bf16.xpose.msra.mxu0 %v301_v52  ;;  %3235 = vmatpush3.bf16.xpose.msra.mxu1 %v350_v53 }
 0x290   :  { %3240 = vmatprep.subr.bf16.mxu0 %v3672_v0  ;;  %3246 = vmatprep.subr.bf16.mxu1 %v3672_v0 }
 0x291   :  { %v394_v54 = vpop.permute.xlu1 %393  ;;  %v443_v55 = vpop.permute.xlu0 %442 }
 0x292   :  { %v399_v56 = vsel %vm198_vm4, %v394_v54, 0  ;;  %v448_v57 = vsel %vm198_vm4, %v443_v55, 0 }
 0x295   :  { %v492_v58 = vpop.permute.xlu1 %491 }
 0x296   :  { %3231 = vmatmul.mubr.msk.bf16.vlgmr.msra.gmra.mxu0 %vm198_vm4, %v3788_v36  ;;  %3237 = vmatmul.mubr.msk.bf16.vlgmr.msra.gmra.mxu1 %vm198_vm4, %v3786_v35  ;;  %v541_v59 = vpop.permute.xlu0 %540  ;;  %v497_v60 = vsel %vm198_vm4, %v492_v58, 0 }
 0x297   :  { %3241 = vmatpush3.bf16.xpose.msra.mxu0 %v399_v56  ;;  %3247 = vmatpush3.bf16.xpose.msra.mxu1 %v448_v57  ;;  %v546_v61 = vsel %vm198_vm4, %v541_v59, 0 }
 0x298   :  { %3242 = vmatprep.mubr.msk.bf16.mxu0 %vm3673_vm0, %v3672_v0  ;;  %3248 = vmatprep.mubr.msk.bf16.mxu1 %vm3673_vm0, %v3672_v0 }
 0x299   :  { %3252 = vmatprep.subr.bf16.mxu0 %v3672_v0  ;;  %3258 = vmatprep.subr.bf16.mxu1 %v3672_v0  ;;  %v734_v62 = vpop.permute.xlu1 %733 }
 0x29a   :  { %v685_v63 = vpop.permute.xlu0 %684  ;;  %v739_v1 = vsel %vm689_vm5, %v734_v62, 0 }
 0x29b   :  { %v691_v2 = vsel %vm689_vm5, %v685_v63, 0 }
 0x29e   :  { %3243 = vmatmul.mubr.msk.bf16.vlgmr.msra.gmra.mxu0 %vm198_vm4, %v3797_v44  ;;  %3249 = vmatmul.mubr.msk.bf16.vlgmr.msra.gmra.mxu1 %vm198_vm4, %v3795_v43 }
 0x29f   :  { %3253 = vmatpush3.bf16.xpose.msra.mxu0 %v497_v60  ;;  %3259 = vmatpush3.bf16.xpose.msra.mxu1 %v546_v61 }
 0x2a0   :  { %3254 = vmatprep.mubr.msk.bf16.mxu0 %vm3673_vm0, %v3672_v0  ;;  %3260 = vmatprep.mubr.msk.bf16.mxu1 %vm3673_vm0, %v3672_v0 }
 0x2a1   :  { %3264 = vmatprep.subr.bf16.mxu0 %v3672_v0  ;;  %3270 = vmatprep.subr.bf16.mxu1 %v3672_v0 }
 0x2a6   :  { %3255 = vmatmul.mubr.msk.bf16.vlgmr.msra.gmra.mxu0 %vm198_vm4, %v3805_v48  ;;  %3261 = vmatmul.mubr.msk.bf16.vlgmr.msra.gmra.mxu1 %vm198_vm4, %v3808_v49 }
 0x2a7   :  { %3265 = vmatpush3.bf16.msra.mxu0 %v691_v2  ;;  %3271 = vmatpush3.bf16.msra.mxu1 %v739_v1 }
 0x2a8   :  { %3266 = vmatprep.mubr.msk.bf16.mxu0 %vm3673_vm0, %v3672_v0  ;;  %3272 = vmatprep.mubr.msk.bf16.mxu1 %vm3673_vm0, %v3672_v0 }
 0x2a9   :  { %3276 = vmatprep.subr.bf16.mxu0 %v3672_v0  ;;  %3282 = vmatprep.subr.bf16.mxu1 %v3672_v0 }
 0x2e3   :  { %v239_v3 = vpop.f32.mrf.mxu0 }
 0x2e4   :  { %v588_v4 = vsel %vm198_vm4, %v239_v3, -inf }
 0x2e5   :  { %589 = vmax.xlane.f32.xlu1 %v588_v4  ;;  %v3220_v5 = vpop.f32.mrf.mxu0 }
 0x2e7   :  { %v242_v6 = vpop.f32.mrf.mxu0  ;;  %v288_v7 = vpop.f32.mrf.mxu1 }
 0x2e8   :  { %v591_v8 = vsel %vm198_vm4, %v288_v7, -inf }
 0x2e9   :  { %592 = vmax.xlane.f32.xlu0 %v591_v8  ;;  %v3221_v9 = vpop.f32.mrf.mxu0  ;;  %v3226_v10 = vpop.f32.mrf.mxu1 }
 0x2eb   :  { %v291_v11 = vpop.f32.mrf.mxu1 }
 0x2ed   :  { %v3227_v12 = vpop.f32.mrf.mxu1 }
 0x356   :  { %v337_v15 = vpop.f32.mrf.mxu0  ;;  %v386_v16 = vpop.f32.mrf.mxu1 }
 0x357   :  { %v597_v17 = vsel %vm198_vm4, %v386_v16, -inf  ;;  %v594_v21 = vsel %vm198_vm4, %v337_v15, -inf }
 0x358   :  { %v3238_v22 = vpop.f32.mrf.mxu1  ;;  %598 = vmax.xlane.f32.xlu1 %v597_v17  ;;  %595 = vmax.xlane.f32.xlu0 %v594_v21  ;;  %v3232_v23 = vpop.f32.mrf.mxu0 }
 0x35a   :  { %v340_v24 = vpop.f32.mrf.mxu0  ;;  %v389_v25 = vpop.f32.mrf.mxu1 }
 0x35c   :  { %v3233_v26 = vpop.f32.mrf.mxu0  ;;  %v3239_v27 = vpop.f32.mrf.mxu1 }
 0x35e   :  { %v3866_v28 = vpop.f32.mrf.mxu0  ;;  %v484_v29 = vpop.f32.mrf.mxu1 }
 0x35f   :  { %v603_v30 = vsel %vm198_vm4, %v484_v29, -inf  ;;  %v600_v31 = vsel %vm198_vm4, %v3866_v28, -inf }
 0x360   :  { %v3250_v32 = vpop.f32.mrf.mxu1  ;;  %604 = vmax.xlane.f32.xlu1 %v603_v30  ;;  %601 = vmax.xlane.f32.xlu0 %v600_v31  ;;  %v3244_v33 = vpop.f32.mrf.mxu0 }
 0x362   :  { %v438_v34 = vpop.f32.mrf.mxu0  ;;  %v487_v37 = vpop.f32.mrf.mxu1 }
 0x364   :  { %v3245_v38 = vpop.f32.mrf.mxu0  ;;  %v3251_v39 = vpop.f32.mrf.mxu1 }
 0x366   :  { %v3871_v40 = vpop.f32.mrf.mxu0  ;;  %v582_v41 = vpop.f32.mrf.mxu1 }
 0x367   :  { %v609_v42 = vsel %vm198_vm4, %v582_v41, -inf  ;;  %v606_v45 = vsel %vm198_vm4, %v3871_v40, -inf }
 0x368   :  { %v3262_v46 = vpop.f32.mrf.mxu1  ;;  %610 = vmax.xlane.f32.xlu1 %v609_v42  ;;  %607 = vmax.xlane.f32.xlu0 %v606_v45  ;;  %v3256_v47 = vpop.f32.mrf.mxu0 }
 0x36a   :  { %v536_v50 = vpop.f32.mrf.mxu0  ;;  %v585_v51 = vpop.f32.mrf.mxu1 }
 0x36c   :  { %v3257_v52 = vpop.f32.mrf.mxu0  ;;  %v3263_v53 = vpop.f32.mrf.mxu1 }
 0x36e   :  { %v590_v54 = vpop.xlane.xlu1 %589 }
 0x36f   :  { %v612_v56 = vsub.f32 %v239_v3, %v590_v54 }
 0x371   :  { %v620_v58 = vmul.f32 1.442695, %v612_v56 }
 0x372   :  { %v593_v55 = vpop.xlane.xlu0 %592 }
 0x373   :  { %v613_v57 = vsub.f32 %v288_v7, %v593_v55  ;;  %3569 = vpow2.f32 %v620_v58 }
 0x375   :  { %v622_v59 = vmul.f32 1.442695, %v613_v57 }
 0x377   :  { %3571 = vpow2.f32 %v622_v59 }
 0x379   :  { %781 = vrot.lane.b32.xlu1 %v3788_v36, %s3678_s29 }
 0x37e   :  { %829 = vrot.lane.b32.xlu0 %v3786_v35, %s3678_s29 }
 0x380   :  { %v3570_v60 = vpop.eup %3569 }
 0x381   :  { %v636_v63 = vsel %vm198_vm4, %v3570_v60, 0.0 }
 0x384   :  { %v3572_v61 = vpop.eup %3571 }
 0x385   :  { %v639_v62 = vsel %vm198_vm4, %v3572_v61, 0.0 }
 0x39d   :  { %640 = vadd.xlane.f32.xlu1 %v639_v62  ;;  %637 = vadd.xlane.f32.xlu0 %v636_v63 }
 0x3ae   :  { %877 = vrot.lane.b32.xlu1 %v3797_v44, %s3678_s29 }
 0x3e1   :  { %v599_v35 = vpop.xlane.xlu1 %598  ;;  %v596_v36 = vpop.xlane.xlu0 %595 }
 0x3e2   :  { %v615_v1 = vsub.f32 %v386_v16, %v599_v35  ;;  %v614_v2 = vsub.f32 %v337_v15, %v596_v36 }
 0x3e4   :  { %v626_v3 = vmul.f32 1.442695, %v615_v1  ;;  %v624_v4 = vmul.f32 1.442695, %v614_v2 }
 0x3e6   :  { %3573 = vpow2.f32 %v626_v3 }
 0x3e7   :  { %3575 = vpow2.f32 %v624_v4 }
 0x3e9   :  { %v605_v5 = vpop.xlane.xlu1 %604  ;;  %v602_v23 = vpop.xlane.xlu0 %601 }
 0x3ea   :  { %v617_v6 = vsub.f32 %v484_v29, %v605_v5  ;;  %v616_v24 = vsub.f32 %v3866_v28, %v602_v23 }
 0x3ec   :  { %v630_v7 = vmul.f32 1.442695, %v617_v6  ;;  %v628_v26 = vmul.f32 1.442695, %v616_v24 }
 0x3ee   :  { %3577 = vpow2.f32 %v630_v7 }
 0x3f1   :  { %v611_v8 = vpop.xlane.xlu1 %610  ;;  %v608_v25 = vpop.xlane.xlu0 %607 }
 0x3f2   :  { %v619_v9 = vsub.f32 %v582_v41, %v611_v8  ;;  %v618_v27 = vsub.f32 %v3871_v40, %v608_v25 }
 0x3f3   :  { %v3574_v10 = vpop.eup %3573 }
 0x3f4   :  { %v3884_v11 = vpop.eup %3575  ;;  %v634_v12 = vmul.f32 1.442695, %v619_v9  ;;  %v645_v44 = vsel %vm198_vm4, %v3574_v10, 0.0  ;;  %v632_v29 = vmul.f32 1.442695, %v618_v27 }
 0x3f5   :  { %646 = vadd.xlane.f32.xlu1 %v645_v44  ;;  %v642_v15 = vsel %vm198_vm4, %v3884_v11, 0.0  ;;  %v782_v30 = vpop.permute.xlu1 %781  ;;  %v830_v31 = vpop.permute.xlu0 %829 }
 0x3f6   :  { %3579 = vpow2.f32 %v634_v12  ;;  %643 = vadd.xlane.f32.xlu0 %v642_v15  ;;  %v835_v45 = vsel %vm689_vm5, %v830_v31, 0  ;;  %v787_v46 = vsel %vm689_vm5, %v782_v30, 0  ;;  %v1070_v15 = vld [vmem:[%s4381_s4] sm:$0xf] }
 0x3f7   :  { %3581 = vpow2.f32 %v628_v26 }
 0x3f8   :  { %3583 = vpow2.f32 %v632_v29 }
 0x3fb   :  { %v3889_v16 = vpop.eup %3577 }
 0x3fc   :  { %v651_v17 = vsel %vm198_vm4, %v3889_v16, 0.0 }
 0x3fd   :  { %652 = vadd.xlane.f32.xlu1 %v651_v17  ;;  %v1075_v17 = vsel %vm689_vm5, %v1070_v15, 0 }
 0x403   :  { %v3893_v21 = vpop.eup %3579 }
 0x404   :  { %v657_v22 = vsel %vm198_vm4, %v3893_v21, 0.0  ;;  %v3903_v34 = vpop.eup %3581 }
 0x405   :  { %658 = vadd.xlane.f32.xlu1 %v657_v22  ;;  %v3907_v28 = vpop.eup %3583 }
 0x40c   :  { %925 = vrot.lane.b32.xlu0 %v3795_v43, %s3678_s29  ;;  %v648_v43 = vsel %vm198_vm4, %v3903_v34, 0.0 }
 0x416   :  { %973 = vrot.lane.b32.xlu1 %v3805_v48, %s3678_s29  ;;  %v654_v48 = vsel %vm198_vm4, %v3907_v28, 0.0 }
 0x426   :  { %v641_v32 = vpop.xlane.xlu1 %640  ;;  %v638_v33 = vpop.xlane.xlu0 %637 }
 0x427   :  { %3585 = vrcp.f32 %v641_v32 }
 0x428   :  { %3587 = vrcp.f32 %v638_v33  ;;  %v1176_v33 = vld [vmem:[%s4381_s4 + $0x8] sm:$0xf] }
 0x42a   :  { %v878_v47 = vpop.permute.xlu1 %877 }
 0x42b   :  { %649 = vadd.xlane.f32.xlu0 %v648_v43  ;;  %v1227_v43 = vld [vmem:[%s4381_s4 + $0xc] sm:$0xf] }
 0x42f   :  { %655 = vadd.xlane.f32.xlu0 %v654_v48 }
 0x434   :  { %v3586_v37 = vpop.eup %3585 }
 0x435   :  { %v3588_v38 = vpop.eup %3587  ;;  %v669_v39 = vmul.f32 %v3586_v37, %v3572_v61 }
 0x436   :  { %v668_v40 = vmul.f32 %v3588_v38, %v3570_v60 }
 0x437   :  { %v677_v41 = vpack.c.bf16 %v669_v39, %v669_v39  ;;  %v1232_v39 = vsel %vm689_vm5, %v1227_v43, 0 }
 0x438   :  { %v676_v42 = vpack.c.bf16 %v668_v40, %v668_v40 }
 0x439   :  { %3273 = vmatmul.mubr.msk.bf16.vlgmr.msra.gmra.mxu1 %vm198_vm4, %v677_v41 }
 0x43a   :  { %3267 = vmatmul.mubr.msk.bf16.vlgmr.msra.gmra.mxu0 %vm198_vm4, %v676_v42  ;;  %3283 = vmatpush3.bf16.msra.mxu1 %v835_v45 }
 0x43b   :  { %3277 = vmatpush3.bf16.msra.mxu0 %v787_v46  ;;  %3278 = vmatprep.mubr.msk.bf16.mxu0 %vm3673_vm0, %v3672_v0 }
 0x43c   :  { %3284 = vmatprep.mubr.msk.bf16.mxu1 %vm3673_vm0, %v3672_v0  ;;  %3288 = vmatprep.subr.bf16.mxu0 %v3672_v0 }
 0x43d   :  { %3294 = vmatprep.subr.bf16.mxu1 %v3672_v0 }
 0x445   :  { %1021 = vrot.lane.b32.xlu0 %v3808_v49, %s3678_s29  ;;  %v883_v49 = vsel %vm689_vm5, %v878_v47, 0 }
 0x47e   :  { %v647_v50 = vpop.xlane.xlu1 %646 }
 0x47f   :  { %3589 = vrcp.f32 %v647_v50  ;;  %v644_v51 = vpop.xlane.xlu0 %643 }
 0x480   :  { %3591 = vrcp.f32 %v644_v51 }
 0x483   :  { %v926_v56 = vpop.permute.xlu0 %925 }
 0x484   :  { %v931_v60 = vsel %vm689_vm5, %v926_v56, 0 }
 0x486   :  { %v653_v52 = vpop.xlane.xlu1 %652 }
 0x487   :  { %3593 = vrcp.f32 %v653_v52 }
 0x48c   :  { %v3590_v53 = vpop.eup %3589 }
 0x48d   :  { %v3592_v54 = vpop.eup %3591  ;;  %v671_v55 = vmul.f32 %v3590_v53, %v3574_v10 }
 0x48e   :  { %v670_v57 = vmul.f32 %v3592_v54, %v3884_v11  ;;  %v659_v35 = vpop.xlane.xlu1 %658 }
 0x48f   :  { %v679_v58 = vpack.c.bf16 %v671_v55, %v671_v55  ;;  %3595 = vrcp.f32 %v659_v35 }
 0x490   :  { %v678_v59 = vpack.c.bf16 %v670_v57, %v670_v57 }
 0x491   :  { %3285 = vmatmul.mubr.msk.bf16.vlgmr.msra.gmra.mxu1 %vm198_vm4, %v679_v58 }
 0x492   :  { %3279 = vmatmul.mubr.msk.bf16.vlgmr.msra.gmra.mxu0 %vm198_vm4, %v678_v59  ;;  %3295 = vmatpush3.bf16.msra.mxu1 %v931_v60  ;;  %v974_v9 = vpop.permute.xlu1 %973 }
 0x493   :  { %3289 = vmatpush3.bf16.msra.mxu0 %v883_v49  ;;  %3296 = vmatprep.mubr.msk.bf16.mxu1 %vm3673_vm0, %v3672_v0  ;;  %v979_v12 = vsel %vm689_vm5, %v974_v9, 0  ;;  %v1120_v9 = vsub.s32 2, %v3770_v18 }
 0x494   :  { %v3594_v61 = vpop.eup %3593  ;;  %3306 = vmatprep.subr.bf16.mxu1 %v3672_v0  ;;  %3290 = vmatprep.mubr.msk.bf16.mxu0 %vm3673_vm0, %v3672_v0 }
 0x495   :  { %v673_v62 = vmul.f32 %v3594_v61, %v3889_v16  ;;  %3300 = vmatprep.subr.bf16.mxu0 %v3672_v0 }
 0x497   :  { %v681_v63 = vpack.c.bf16 %v673_v62, %v673_v62 }
 0x499   :  { %3297 = vmatmul.mubr.msk.bf16.vlgmr.msra.gmra.mxu1 %vm198_vm4, %v681_v63 }
 0x49a   :  { %3308 = vmatprep.mubr.msk.bf16.mxu1 %vm3673_vm0, %v3672_v0 }
 0x49c   :  { %v3596_v1 = vpop.eup %3595 }
 0x49d   :  { %v675_v3 = vmul.f32 %v3596_v1, %v3893_v21  ;;  %v1125_v21 = vld [vmem:[%s4381_s4 + $0x4] sm:$0xf] }
 0x49e   :  { %v1130_v22 = vsel %vm689_vm5, %v1125_v21, 0 }
 0x49f   :  { %v683_v6 = vpack.c.bf16 %v675_v3, %v675_v3 }
 0x4b4   :  { %v650_v36 = vpop.xlane.xlu0 %649 }
 0x4b5   :  { %3597 = vrcp.f32 %v650_v36 }
 0x4b8   :  { %v656_v2 = vpop.xlane.xlu0 %655 }
 0x4b9   :  { %3599 = vrcp.f32 %v656_v2 }
 0x4bc   :  { %v1022_v4 = vpop.permute.xlu0 %1021 }
 0x4bd   :  { %v1027_v5 = vsel %vm689_vm5, %v1022_v4, 0 }
 0x4be   :  { %3307 = vmatpush3.bf16.msra.mxu1 %v1027_v5 }
 0x4bf   :  { %3318 = vmatprep.subr.bf16.mxu1 %v3672_v0 }
 0x4c1   :  { %3309 = vmatmul.mubr.msk.bf16.vlgmr.msra.gmra.mxu1 %vm198_vm4, %v683_v6 }
 0x4c2   :  { %v3598_v7 = vpop.eup %3597  ;;  %3320 = vmatprep.mubr.msk.bf16.mxu1 %vm3673_vm0, %v3672_v0  ;;  %3319 = vmatpush3.bf16.msra.mxu1 %v1130_v22 }
 0x4c3   :  { %v672_v8 = vmul.f32 %v3598_v7, %v3903_v34  ;;  %3330 = vmatprep.subr.bf16.mxu1 %v3672_v0  ;;  %v1181_v34 = vsel %vm689_vm5, %v1176_v33, 0 }
 0x4c5   :  { %v680_v10 = vpack.c.bf16 %v672_v8, %v672_v8 }
 0x4c6   :  { %v3600_v11 = vpop.eup %3599 }
 0x4c7   :  { %3291 = vmatmul.mubr.msk.bf16.vlgmr.msra.gmra.mxu0 %vm198_vm4, %v680_v10  ;;  %v674_v44 = vmul.f32 %v3600_v11, %v3907_v28  ;;  %v1121_v10 = vrot.slane %v3776_v20, %v1120_v9 }
 0x4c8   :  { %3301 = vmatpush3.bf16.msra.mxu0 %v979_v12  ;;  %3302 = vmatprep.mubr.msk.bf16.mxu0 %vm3673_vm0, %v3672_v0 }
 0x4c9   :  { %3312 = vmatprep.subr.bf16.mxu0 %v3672_v0  ;;  %v682_v16 = vpack.c.bf16 %v674_v44, %v674_v44 }
 0x4cf   :  { %3303 = vmatmul.mubr.msk.bf16.vlgmr.msra.gmra.mxu0 %vm198_vm4, %v682_v16 }
 0x4d0   :  { %3313 = vmatpush3.bf16.msra.mxu0 %v1075_v17  ;;  %3314 = vmatprep.mubr.msk.bf16.mxu0 %vm3673_vm0, %v3672_v0 }
 0x4d1   :  { %3324 = vmatprep.subr.bf16.mxu0 %v3672_v0 }
 0x4f9   :  { %v775_v23 = vpop.f32.mrf.mxu1 }
 0x4fa   :  { %v727_v24 = vpop.f32.mrf.mxu0 }
 0x4fb   :  { %v1069_v25 = vpack.c.bf16 %v775_v23, %v727_v24  ;;  %v3274_v26 = vpop.f32.mrf.mxu1 }
 0x4fc   :  { %v3268_v27 = vpop.f32.mrf.mxu0 }
 0x4fd   :  { %3315 = vmatmul.mubr.msk.bf16.vlgmr.msra.gmra.mxu0 %vm198_vm4, %v1069_v25  ;;  %v778_v29 = vpop.f32.mrf.mxu1 }
 0x4fe   :  { %v730_v30 = vpop.f32.mrf.mxu0  ;;  %3326 = vmatprep.mubr.msk.bf16.mxu0 %vm3673_vm0, %v3672_v0  ;;  %3325 = vmatpush3.bf16.msra.mxu0 %v1181_v34 }
 0x4ff   :  { %v3275_v31 = vpop.f32.mrf.mxu1  ;;  %3336 = vmatprep.subr.bf16.mxu0 %v3672_v0 }
 0x500   :  { %v3269_v32 = vpop.f32.mrf.mxu0 }
 0x551   :  { %v871_v28 = vpop.f32.mrf.mxu1 }
 0x552   :  { %v823_v48 = vpop.f32.mrf.mxu0 }
 0x553   :  { %v1124_v37 = vpack.c.bf16 %v871_v28, %v823_v48  ;;  %v3286_v38 = vpop.f32.mrf.mxu1 }
 0x554   :  { %v3280_v40 = vpop.f32.mrf.mxu0 }
 0x555   :  { %3321 = vmatmul.mubr.msk.bf16.vlgmr.msra.gmra.mxu1 %vm198_vm4, %v1124_v37  ;;  %v874_v41 = vpop.f32.mrf.mxu1 }
 0x556   :  { %v826_v42 = vpop.f32.mrf.mxu0  ;;  %3331 = vmatpush3.bf16.msra.mxu1 %v1232_v39  ;;  %3332 = vmatprep.mubr.msk.bf16.mxu1 %vm3673_vm0, %v3672_v0 }
 0x557   :  { %v3287_v45 = vpop.f32.mrf.mxu1  ;;  %3344 = vmatprep.subr.bf16.mxu1 %v3672_v0 }
 0x558   :  { %v3281_v46 = vpop.f32.mrf.mxu0 }
 0x559   :  { %v967_v47 = vpop.f32.mrf.mxu1  ;;  %v3556_v46 = vld [vmem:[%s4382_s5] sm:$0xff]  }
 0x55b   :  { %v3298_v50 = vpop.f32.mrf.mxu1 }
 0x55d   :  { %v970_v51 = vpop.f32.mrf.mxu1 }
 0x55f   :  { %v3299_v52 = vpop.f32.mrf.mxu1 }
 0x581   :  { %v1063_v53 = vpop.f32.mrf.mxu1 }
 0x583   :  { %v3310_v54 = vpop.f32.mrf.mxu1 }
 0x585   :  { %v1066_v55 = vpop.f32.mrf.mxu1 }
 0x587   :  { %v919_v56 = vpop.f32.mrf.mxu0  ;;  %v3311_v57 = vpop.f32.mrf.mxu1 }
 0x588   :  { %v1175_v58 = vpack.c.bf16 %v967_v47, %v919_v56  ;;  %v3557_v47 = vld [vmem:[%s4383_s6 + $0x18] sm:$0xff]   ;;  %v1308_v56 = vsub.s32 3, %v3770_v18 }
 0x589   :  { %v3292_v59 = vpop.f32.mrf.mxu0 }
 0x58a   :  { %3327 = vmatmul.mubr.msk.bf16.vlgmr.msra.gmra.mxu0 %vm198_vm4, %v1175_v58  ;;  %v1309_v59 = vrot.slane %v3776_v20, %v1308_v56 }
 0x58b   :  { %v922_v60 = vpop.f32.mrf.mxu0  ;;  %3340 = vmatprep.mubr.msk.bf16.mxu0 %vm3673_vm0, %v3672_v0 }
 0x58c   :  { %v1314_v60 = vsub.s32 4, %v3770_v18 }
 0x58d   :  { %v3293_v49 = vpop.f32.mrf.mxu0 }
 0x58f   :  { %v1015_v61 = vpop.f32.mrf.mxu0 }
 0x590   :  { %v1226_v62 = vpack.c.bf16 %v1063_v53, %v1015_v61 }
 0x591   :  { %v3304_v63 = vpop.f32.mrf.mxu0 }
 0x592   :  { %3333 = vmatmul.mubr.msk.bf16.vlgmr.msra.gmra.mxu1 %vm198_vm4, %v1226_v62  ;;  %v1315_v63 = vrot.slane %v3776_v20, %v1314_v60 }
 0x593   :  { %v1018_v35 = vpop.f32.mrf.mxu0  ;;  %3352 = vmatprep.mubr.msk.bf16.mxu1 %vm3673_vm0, %v3672_v0  ;;  %3345 = vmatpush3.bf16.msra.mxu1 %v3557_v47 }
 0x594   :  { %3346 = vmatprep.subr.bf16.mxu1 %v3672_v0 }
 0x595   :  { %v3305_v36 = vpop.f32.mrf.mxu0 }
 0x5bd   :  { %v1111_v1 = vpop.f32.mrf.mxu0 }
 0x5be   :  { %v1122_v44 = vadd.f32 %v1121_v10, %v1111_v1 }
 0x5bf   :  { %v3316_v2 = vpop.f32.mrf.mxu0 }
 0x5c1   :  { %v1114_v3 = vpop.f32.mrf.mxu0 }
 0x5c2   :  { %v1123_v21 = vadd.f32 %v1121_v10, %v1114_v3  ;;  %v3558_v3 = vld [vmem:[%s4383_s6 + $0x10] sm:$0xff]  }
 0x5c3   :  { %v3317_v4 = vpop.f32.mrf.mxu0  ;;  %3347 = vmatpush3.bf16.msra.mxu1 %v3558_v3  ;;  %v4074_v3 = vld [vmem:[%s4384_s7 + $0x8] sm:$0xff] }
 0x5c4   :  { %3348 = vmatprep.subr.bf16.mxu1 %v3672_v0  ;;  %v3559_v4 = vld [vmem:[%s4383_s6 + $0x8] sm:$0xff]  }
 0x5c7   :  { %3349 = vmatpush3.bf16.msra.mxu1 %v3559_v4 }
 0x5c8   :  { %3350 = vmatprep.subr.bf16.mxu1 %v3672_v0 }
 0x615   :  { %v1166_v5 = vpop.f32.mrf.mxu1 }
 0x616   :  { %v1173_v16 = vadd.f32 %v1166_v5, %v1122_v44  ;;  %v3560_v5 = vld [vmem:[%s4383_s6] sm:$0xff]  }
 0x617   :  { %v3322_v6 = vpop.f32.mrf.mxu1  ;;  %3351 = vmatpush3.bf16.msra.mxu1 %v3560_v5 }
 0x618   :  { %3370 = vmatprep.subr.bf16.mxu1 %v3672_v0  ;;  %v1325_v6 = vsub.s32 1, %v3770_v18 }
 0x619   :  { %v1169_v7 = vpop.f32.mrf.mxu1 }
 0x61a   :  { %v1174_v24 = vadd.f32 %v1169_v7, %v1123_v21  ;;  %v1326_v7 = vrot.slane %v3776_v20, %v1325_v6 }
 0x61b   :  { %v3323_v8 = vpop.f32.mrf.mxu1 }
 0x64a   :  { %v1217_v11 = vpop.f32.mrf.mxu0 }
 0x64b   :  { %v1224_v22 = vadd.f32 %v1217_v11, %v1173_v16 }
 0x64c   :  { %v3328_v12 = vpop.f32.mrf.mxu0 }
 0x64e   :  { %v1220_v15 = vpop.f32.mrf.mxu0 }
 0x64f   :  { %v1225_v27 = vadd.f32 %v1220_v15, %v1174_v24 }
 0x650   :  { %v3329_v17 = vpop.f32.mrf.mxu0 }
 0x652   :  { %v1268_v23 = vpop.f32.mrf.mxu1 }
 0x653   :  { %v1275_v25 = vadd.f32 %v1268_v23, %v1224_v22  ;;  %v1396_v22 = vsub.s32 7, %v3770_v18 }
 0x654   :  { %v3334_v26 = vpop.f32.mrf.mxu1 }
 0x655   :  { %v1277_v29 = vadd.f32 %v1275_v25, %v3761_v13  ;;  %v1397_v23 = vrot.slane %v3776_v20, %v1396_v22 }
 0x656   :  { %v1271_v30 = vpop.f32.mrf.mxu1 }
 0x657   :  { %v1276_v31 = vadd.f32 %v1271_v30, %v1225_v27  ;;  %v1279_v32 = vsel %vm122_vm3, %v1277_v29, 0.0 }
 0x658   :  { %v3335_v33 = vpop.f32.mrf.mxu1  ;;  %1280 = vadd.xlane.f32.xlu1 %v1279_v32 }
 0x659   :  { %v1278_v34 = vadd.f32 %v1276_v31, %v3763_v14  ;;  %v3555_v14 = vld [vmem:[%s4382_s5 + $0x8] sm:$0xff]  }
 0x65a   :  { %3337 = vmatpush3.bf16.msra.mxu0 %v3555_v14  ;;  %v3562_v14 = vld [vmem:[%s4380_s3 + $0x10] sm:$0xff]  }
 0x65b   :  { %v1282_v43 = vsel %vm122_vm3, %v1278_v34, 0.0  ;;  %3338 = vmatprep.subr.bf16.mxu0 %v3672_v0 }
 0x65c   :  { %1283 = vadd.xlane.f32.xlu0 %v1282_v43 }
 0x65e   :  { %3339 = vmatpush3.bf16.msra.mxu0 %v3556_v46 }
 0x65f   :  { %3356 = vmatprep.subr.bf16.mxu0 %v3672_v0 }
 0x6e1   :  { %v1281_v28 = vpop.xlane.xlu1 %1280 }
 0x6e2   :  { %v1286_v48 = vmul.f32 0.03125, %v1281_v28 }
 0x6e4   :  { %v1288_v37 = vsub.f32 %v1277_v29, %v1286_v48 }
 0x6e5   :  { %v1284_v38 = vpop.xlane.xlu0 %1283 }
 0x6e6   :  { %v1287_v39 = vmul.f32 0.03125, %v1284_v38  ;;  %v1290_v40 = vmul.f32 %v1288_v37, %v1288_v37 }
 0x6e8   :  { %v1289_v41 = vsub.f32 %v1278_v34, %v1287_v39  ;;  %v1292_v13 = vsel %vm122_vm3, %v1290_v40, 0.0 }
 0x6e9   :  { %1293 = vadd.xlane.f32.xlu0 %v1292_v13 }
 0x6ea   :  { %v1291_v42 = vmul.f32 %v1289_v41, %v1289_v41 }
 0x6ec   :  { %v1295_v45 = vsel %vm122_vm3, %v1291_v42, 0.0 }
 0x6ed   :  { %1296 = vadd.xlane.f32.xlu1 %v1295_v45  ;;  %v3561_v45 = vld [vmem:[%s4380_s3 + $0x18] sm:$0xff]  }
 0x772   :  { %v1294_v50 = vpop.xlane.xlu0 %1293 }
 0x773   :  { %v1298_v51 = vmul.f32 0.03125, %v1294_v50 }
 0x775   :  { %v1300_v52 = vadd.f32 1e-05, %v1298_v51 }
 0x776   :  { %v1297_v53 = vpop.xlane.xlu1 %1296 }
 0x777   :  { %3601 = vrsqrt.f32 %v1300_v52  ;;  %v1299_v54 = vmul.f32 0.03125, %v1297_v53 }
 0x779   :  { %v1301_v55 = vadd.f32 1e-05, %v1299_v54  ;;  %v1497_v54 = vsub.s32 5, %v3770_v18 }
 0x77b   :  { %3603 = vrsqrt.f32 %v1301_v55 }
 0x784   :  { %v3602_v57 = vpop.eup %3601 }
 0x785   :  { %v1304_v58 = vmul.f32 %v3602_v57, %v1288_v37 }
 0x787   :  { %v1310_v62 = vmul.f32 %v1309_v59, %v1304_v58  ;;  %v1498_v58 = vrot.slane %v3776_v20, %v1497_v54 }
 0x788   :  { %v3604_v49 = vpop.eup %3603 }
 0x789   :  { %v1305_v61 = vmul.f32 %v3604_v49, %v1289_v41  ;;  %v1316_v36 = vadd.f32 %v1315_v63, %v1310_v62 }
 0x78b   :  { %v1311_v35 = vmul.f32 %v1309_v59, %v1305_v61  ;;  %v1503_v59 = vsub.s32 6, %v3770_v18 }
 0x78d   :  { %v1317_v1 = vadd.f32 %v1315_v63, %v1311_v35  ;;  %v1504_v63 = vrot.slane %v3776_v20, %v1503_v59  ;;  %v1518_v20 = vrot.slane %v4074_v3, %v108_v19 }
 0x78f   :  { %v1318_v2 = vpack.c.bf16 %v1317_v1, %v1316_v36 }
 0x791   :  { %3341 = vmatmul.mubr.msk.bf16.vlgmr.msra.gmra.mxu0 %vm122_vm3, %v1318_v2 }
 0x792   :  { %3360 = vmatprep.mubr.msk.bf16.mxu0 %vm3673_vm0, %v3672_v0  ;;  %3357 = vmatpush3.bf16.msra.mxu0 %v3561_v45 }
 0x793   :  { %3358 = vmatprep.subr.bf16.mxu0 %v3672_v0 }
 0x796   :  { %3359 = vmatpush3.bf16.msra.mxu0 %v3562_v14 }
 0x797   :  { %3364 = vmatprep.subr.bf16.mxu0 %v3672_v0 }
 0x851   :  { %v1376_v8 = vpop.f32.mrf.mxu0 }
 0x852   :  { %v1377_v11 = vadd.f32 %v1376_v8, %v1326_v7 }
 0x853   :  { %v3342_v10 = vpop.f32.mrf.mxu0 }
 0x854   :  { %v1383_v16 = vmax.f32 %v1377_v11, 0.0 }
 0x855   :  { %v1379_v12 = vpop.f32.mrf.mxu0 }
 0x856   :  { %v1380_v44 = vadd.f32 %v1379_v12, %v1326_v7 }
 0x857   :  { %v3343_v15 = vpop.f32.mrf.mxu0 }
 0x858   :  { %v1384_v17 = vmax.f32 %v1380_v44, 0.0 }
 0x85a   :  { %v1385_v21 = vpack.c.bf16 %v1384_v17, %v1383_v16 }
 0x85c   :  { %3353 = vmatmul.mubr.msk.bf16.vlgmr.msra.gmra.mxu1 %vm1422_vm6, %v1385_v21 }
 0x85d   :  { %3372 = vmatprep.mubr.msk.bf16.mxu1 %vm3673_vm0, %v3672_v0 }
 0x91c   :  { %v1460_v24 = vpop.f32.mrf.mxu1 }
 0x91d   :  { %v1461_v25 = vadd.f32 %v1460_v24, %v1397_v23 }
 0x91e   :  { %v3354_v26 = vpop.f32.mrf.mxu1 }
 0x91f   :  { %v1467_v27 = vadd.f32 %v1461_v25, %v1316_v36 }
 0x920   :  { %v1463_v29 = vpop.f32.mrf.mxu1 }
 0x921   :  { %v1464_v30 = vadd.f32 %v1463_v29, %v1397_v23  ;;  %v1469_v31 = vsel %vm122_vm3, %v1467_v27, 0.0 }
 0x922   :  { %1470 = vadd.xlane.f32.xlu0 %v1469_v31  ;;  %v3355_v32 = vpop.f32.mrf.mxu1 }
 0x923   :  { %v1468_v33 = vadd.f32 %v1464_v30, %v1317_v1 }
 0x925   :  { %v1472_v34 = vsel %vm122_vm3, %v1468_v33, 0.0 }
 0x926   :  { %1473 = vadd.xlane.f32.xlu1 %v1472_v34 }
 0x9ab   :  { %v1471_v43 = vpop.xlane.xlu0 %1470 }
 0x9ac   :  { %v1475_v28 = vmul.f32 0.03125, %v1471_v43 }
 0x9ae   :  { %v1477_v48 = vsub.f32 %v1467_v27, %v1475_v28 }
 0x9af   :  { %v1474_v37 = vpop.xlane.xlu1 %1473 }
 0x9b0   :  { %v1476_v38 = vmul.f32 0.03125, %v1474_v37  ;;  %v1479_v39 = vmul.f32 %v1477_v48, %v1477_v48 }
 0x9b2   :  { %v1478_v40 = vsub.f32 %v1468_v33, %v1476_v38  ;;  %v1481_v41 = vsel %vm122_vm3, %v1479_v39, 0.0 }
 0x9b3   :  { %1482 = vadd.xlane.f32.xlu0 %v1481_v41 }
 0x9b4   :  { %v1480_v13 = vmul.f32 %v1478_v40, %v1478_v40 }
 0x9b6   :  { %v1484_v42 = vsel %vm122_vm3, %v1480_v13, 0.0 }
 0x9b7   :  { %1485 = vadd.xlane.f32.xlu1 %v1484_v42 }
 0xa3c   :  { %v1483_v46 = vpop.xlane.xlu0 %1482 }
 0xa3d   :  { %v1487_v47 = vmul.f32 0.03125, %v1483_v46 }
 0xa3f   :  { %v1489_v50 = vadd.f32 1e-05, %v1487_v47 }
 0xa40   :  { %v1486_v51 = vpop.xlane.xlu1 %1485 }
 0xa41   :  { %3605 = vrsqrt.f32 %v1489_v50  ;;  %v1488_v52 = vmul.f32 0.03125, %v1486_v51 }
 0xa43   :  { %v1490_v53 = vadd.f32 1e-05, %v1488_v52 }
 0xa45   :  { %3607 = vrsqrt.f32 %v1490_v53 }
 0xa4e   :  { %v3606_v55 = vpop.eup %3605 }
 0xa4f   :  { %v1493_v57 = vmul.f32 %v3606_v55, %v1477_v48 }
 0xa51   :  { %v1499_v62 = vmul.f32 %v1498_v58, %v1493_v57 }
 0xa52   :  { %v3608_v49 = vpop.eup %3607 }
 0xa53   :  { %v1494_v61 = vmul.f32 %v3608_v49, %v1478_v40  ;;  %v4062_v36 = vadd.f32 %v1504_v63, %v1499_v62 }
 0xa55   :  { %v1500_v35 = vmul.f32 %v1498_v58, %v1494_v61 }
 0xa57   :  { %v4064_v1 = vadd.f32 %v1504_v63, %v1500_v35 }
 0xa59   :  { %v1509_v2 = vpack.c.bf16 %v4064_v1, %v4062_v36 }
 0xa5b   :  { %3361 = vmatmul.mubr.msk.bf16.vlgmr.msra.gmra.mxu0 %vm122_vm3, %v1509_v2 }
 0xa5c   :  { %3366 = vmatprep.mubr.msk.bf16.mxu0 %vm3673_vm0, %v3672_v0 }
 0xb1b   :  { %v1568_v4 = vpop.f32.mrf.mxu0 }
 0xb1c   :  { %v1569_v8 = vadd.f32 %v1568_v4, %v1518_v20 }
 0xb1d   :  { %v3362_v5 = vpop.f32.mrf.mxu0 }
 0xb1e   :  { %v1595_v44 = vpack.c.bf16 %v1569_v8, %v1569_v8 }
 0xb1f   :  { %v1571_v7 = vpop.f32.mrf.mxu0 }
 0xb20   :  { %v1572_v10 = vadd.f32 %v1571_v7, %v1518_v20 }
 0xb21   :  { %v3363_v11 = vpop.f32.mrf.mxu0 }
 0xb22   :  { %v3543_v12 = vpack.i.bf16 %v1572_v10, %v1569_v8  ;;  %v4083_v15 = vpack.c.bf16 %v1572_v10, %v1572_v10 }
 0xb24   :  { %3544 = vrot.lane.b32.xlu1 %v3543_v12, %s3677_s28  ;;  %3539 = vrot.lane.b32.xlu0 %v3543_v12, %s3675_s26 }
 0xb28   :  { %3549 = vrot.lane.b32.xlu1 %v3543_v12, %s3674_s25  ;;  %1604 = vrot.lane.b32.xlu0 %v1595_v44, %s3676_s27 }
 0xb2c   :  { %1653 = vrot.lane.b32.xlu1 %v4083_v15, %s3676_s27 }
 0xb96   :  { %v3545_v19 = vpop.permute.xlu1 %3544  ;;  %v3540_v16 = vpop.permute.xlu0 %3539 }
 0xb97   :  { %v3542_v17 = vunpack.i.h.bf16 %v3540_v16  ;;  %v3541_v21 = vunpack.i.l.bf16 %v3540_v16  ;;  %v3547_v23 = vunpack.i.h.bf16 %v3545_v19  ;;  %v3546_v24 = vunpack.i.l.bf16 %v3545_v19 }
 0xb99   :  { %v4087_v25 = vpack.c.bf16 %v3542_v17, %v3542_v17  ;;  %v4089_v26 = vpack.c.bf16 %v3541_v21, %v3541_v21  ;;  %v4096_v31 = vpack.c.bf16 %v3547_v23, %v3547_v23  ;;  %v4098_v32 = vpack.c.bf16 %v3546_v24, %v3546_v24 }
 0xb9a   :  { %v3550_v27 = vpop.permute.xlu1 %3549  ;;  %v1605_v29 = vpop.permute.xlu0 %1604 }
 0xb9b   :  { %v1610_v30 = vsel %vm198_vm4, %v1605_v29, 0  ;;  %1702 = vrot.lane.b32.xlu0 %v4089_v26, %s3676_s27  ;;  %1751 = vrot.lane.b32.xlu1 %v4087_v25, %s3676_s27  ;;  %v3551_v33 = vunpack.i.l.bf16 %v3550_v27  ;;  %v3552_v34 = vunpack.i.h.bf16 %v3550_v27 }
 0xb9c   :  { %3365 = vmatpush3.bf16.xpose.msra.mxu0 %v1610_v30 }
 0xb9d   :  { %3376 = vmatprep.subr.bf16.mxu0 %v3672_v0  ;;  %v4106_v48 = vpack.c.bf16 %v3551_v33, %v3551_v33  ;;  %v4109_v37 = vpack.c.bf16 %v3552_v34, %v3552_v34 }
 0xb9e   :  { %v1654_v43 = vpop.permute.xlu1 %1653 }
 0xb9f   :  { %v1659_v28 = vsel %vm198_vm4, %v1654_v43, 0  ;;  %1800 = vrot.lane.b32.xlu0 %v4098_v32, %s3676_s27  ;;  %1849 = vrot.lane.b32.xlu1 %v4096_v31, %s3676_s27 }
 0xba0   :  { %3371 = vmatpush3.bf16.xpose.msra.mxu1 %v1659_v28 }
 0xba1   :  { %3382 = vmatprep.subr.bf16.mxu1 %v3672_v0 }
 0xba3   :  { %3367 = vmatmul.mubr.msk.bf16.vlgmr.msra.gmra.mxu0 %vm198_vm4, %v1595_v44  ;;  %1898 = vrot.lane.b32.xlu0 %v4106_v48, %s3676_s27 }
 0xba4   :  { %1947 = vrot.lane.b32.xlu1 %v4109_v37, %s3676_s27  ;;  %3378 = vmatprep.mubr.msk.bf16.mxu0 %vm3673_vm0, %v3672_v0 }
 0xba7   :  { %3373 = vmatmul.mubr.msk.bf16.vlgmr.msra.gmra.mxu1 %vm198_vm4, %v4083_v15 }
 0xba8   :  { %2091 = vrot.lane.b32.xlu1 %v1595_v44, %s3678_s29  ;;  %3384 = vmatprep.mubr.msk.bf16.mxu1 %vm3673_vm0, %v3672_v0 }
 0xc0d   :  { %v1703_v38 = vpop.permute.xlu0 %1702  ;;  %v1752_v39 = vpop.permute.xlu1 %1751 }
 0xc0e   :  { %v1708_v40 = vsel %vm198_vm4, %v1703_v38, 0  ;;  %v1757_v41 = vsel %vm198_vm4, %v1752_v39, 0 }
 0xc0f   :  { %3377 = vmatpush3.bf16.xpose.msra.mxu0 %v1708_v40  ;;  %3383 = vmatpush3.bf16.xpose.msra.mxu1 %v1757_v41 }
 0xc10   :  { %3388 = vmatprep.subr.bf16.mxu0 %v3672_v0  ;;  %3394 = vmatprep.subr.bf16.mxu1 %v3672_v0 }
 0xc11   :  { %v1801_v13 = vpop.permute.xlu0 %1800  ;;  %v1850_v42 = vpop.permute.xlu1 %1849 }
 0xc12   :  { %v1806_v45 = vsel %vm198_vm4, %v1801_v13, 0  ;;  %v1855_v14 = vsel %vm198_vm4, %v1850_v42, 0 }
 0xc15   :  { %v1899_v46 = vpop.permute.xlu0 %1898 }
 0xc16   :  { %3379 = vmatmul.mubr.msk.bf16.vlgmr.msra.gmra.mxu0 %vm198_vm4, %v4089_v26  ;;  %3385 = vmatmul.mubr.msk.bf16.vlgmr.msra.gmra.mxu1 %vm198_vm4, %v4087_v25  ;;  %v1948_v47 = vpop.permute.xlu1 %1947  ;;  %v1904_v50 = vsel %vm198_vm4, %v1899_v46, 0 }
 0xc17   :  { %3389 = vmatpush3.bf16.xpose.msra.mxu0 %v1806_v45  ;;  %3395 = vmatpush3.bf16.xpose.msra.mxu1 %v1855_v14  ;;  %v1953_v51 = vsel %vm198_vm4, %v1948_v47, 0 }
 0xc18   :  { %3390 = vmatprep.mubr.msk.bf16.mxu0 %vm3673_vm0, %v3672_v0  ;;  %3396 = vmatprep.mubr.msk.bf16.mxu1 %vm3673_vm0, %v3672_v0 }
 0xc19   :  { %3400 = vmatprep.subr.bf16.mxu0 %v3672_v0  ;;  %3406 = vmatprep.subr.bf16.mxu1 %v3672_v0 }
 0xc1a   :  { %v2092_v52 = vpop.permute.xlu1 %2091 }
 0xc1b   :  { %v2097_v53 = vsel %vm689_vm5, %v2092_v52, 0 }
 0xc1e   :  { %3391 = vmatmul.mubr.msk.bf16.vlgmr.msra.gmra.mxu0 %vm198_vm4, %v4098_v32  ;;  %3397 = vmatmul.mubr.msk.bf16.vlgmr.msra.gmra.mxu1 %vm198_vm4, %v4096_v31 }
 0xc1f   :  { %3401 = vmatpush3.bf16.xpose.msra.mxu0 %v1904_v50  ;;  %3407 = vmatpush3.bf16.xpose.msra.mxu1 %v1953_v51 }
 0xc20   :  { %3402 = vmatprep.mubr.msk.bf16.mxu0 %vm3673_vm0, %v3672_v0  ;;  %3408 = vmatprep.mubr.msk.bf16.mxu1 %vm3673_vm0, %v3672_v0 }
 0xc21   :  { %3412 = vmatprep.subr.bf16.mxu0 %v3672_v0  ;;  %3418 = vmatprep.subr.bf16.mxu1 %v3672_v0 }
 0xc26   :  { %3403 = vmatmul.mubr.msk.bf16.vlgmr.msra.gmra.mxu0 %vm198_vm4, %v4106_v48  ;;  %3409 = vmatmul.mubr.msk.bf16.vlgmr.msra.gmra.mxu1 %vm198_vm4, %v4109_v37 }
 0xc27   :  { %3413 = vmatpush3.bf16.msra.mxu0 %v2097_v53  ;;  %3420 = vmatprep.mubr.msk.bf16.mxu1 %vm3673_vm0, %v3672_v0 }
 0xc28   :  { %3414 = vmatprep.mubr.msk.bf16.mxu0 %vm3673_vm0, %v3672_v0  ;;  %3424 = vmatprep.subr.bf16.mxu0 %v3672_v0 }
 0xc63   :  { %v1646_v55 = vpop.f32.mrf.mxu0 }
 0xc64   :  { %v1995_v57 = vsel %vm198_vm4, %v1646_v55, -inf }
 0xc65   :  { %1996 = vmax.xlane.f32.xlu0 %v1995_v57  ;;  %v3368_v58 = vpop.f32.mrf.mxu0 }
 0xc67   :  { %v1649_v49 = vpop.f32.mrf.mxu0  ;;  %v1695_v61 = vpop.f32.mrf.mxu1 }
 0xc68   :  { %v1998_v62 = vsel %vm198_vm4, %v1695_v61, -inf }
 0xc69   :  { %1999 = vmax.xlane.f32.xlu1 %v1998_v62  ;;  %v3369_v63 = vpop.f32.mrf.mxu0  ;;  %v3374_v35 = vpop.f32.mrf.mxu1 }
 0xc6b   :  { %v1698_v2 = vpop.f32.mrf.mxu1 }
 0xc6d   :  { %v3375_v4 = vpop.f32.mrf.mxu1 }
 0xcd6   :  { %v1744_v20 = vpop.f32.mrf.mxu0  ;;  %v1793_v5 = vpop.f32.mrf.mxu1 }
 0xcd7   :  { %v2001_v7 = vsel %vm198_vm4, %v1744_v20, -inf  ;;  %v2004_v44 = vsel %vm198_vm4, %v1793_v5, -inf }
 0xcd8   :  { %v3386_v8 = vpop.f32.mrf.mxu1  ;;  %2002 = vmax.xlane.f32.xlu0 %v2001_v7  ;;  %v3380_v10 = vpop.f32.mrf.mxu0 }
 0xcda   :  { %v1747_v11 = vpop.f32.mrf.mxu0  ;;  %v1796_v12 = vpop.f32.mrf.mxu1 }
 0xcdc   :  { %v3387_v19 = vpop.f32.mrf.mxu1  ;;  %2005 = vmax.xlane.f32.xlu0 %v2004_v44  ;;  %v3381_v16 = vpop.f32.mrf.mxu0 }
 0xcde   :  { %v4165_v17 = vpop.f32.mrf.mxu0  ;;  %v4167_v21 = vpop.f32.mrf.mxu1 }
 0xcdf   :  { %v2010_v23 = vsel %vm198_vm4, %v4167_v21, -inf  ;;  %v2007_v24 = vsel %vm198_vm4, %v4165_v17, -inf }
 0xce0   :  { %v3398_v27 = vpop.f32.mrf.mxu1  ;;  %2011 = vmax.xlane.f32.xlu0 %v2010_v23  ;;  %2008 = vmax.xlane.f32.xlu1 %v2007_v24  ;;  %v3392_v29 = vpop.f32.mrf.mxu0 }
 0xce2   :  { %v1845_v30 = vpop.f32.mrf.mxu0  ;;  %v1894_v33 = vpop.f32.mrf.mxu1 }
 0xce4   :  { %v3393_v34 = vpop.f32.mrf.mxu0  ;;  %v3399_v43 = vpop.f32.mrf.mxu1 }
 0xce6   :  { %v1940_v28 = vpop.f32.mrf.mxu0  ;;  %v1989_v38 = vpop.f32.mrf.mxu1 }
 0xce7   :  { %v2016_v39 = vsel %vm198_vm4, %v1989_v38, -inf  ;;  %v2013_v40 = vsel %vm198_vm4, %v1940_v28, -inf }
 0xce8   :  { %v3410_v41 = vpop.f32.mrf.mxu1  ;;  %2017 = vmax.xlane.f32.xlu0 %v2016_v39  ;;  %2014 = vmax.xlane.f32.xlu1 %v2013_v40  ;;  %v3404_v13 = vpop.f32.mrf.mxu0 }
 0xcea   :  { %v1943_v42 = vpop.f32.mrf.mxu0  ;;  %v1992_v45 = vpop.f32.mrf.mxu1 }
 0xcec   :  { %v3405_v14 = vpop.f32.mrf.mxu0  ;;  %v3411_v46 = vpop.f32.mrf.mxu1 }
 0xcee   :  { %v1997_v51 = vpop.xlane.xlu0 %1996 }
 0xcef   :  { %v2019_v52 = vsub.f32 %v1646_v55, %v1997_v51 }
 0xcf1   :  { %v2027_v57 = vmul.f32 1.442695, %v2019_v52 }
 0xcf2   :  { %v2000_v47 = vpop.xlane.xlu1 %1999 }
 0xcf3   :  { %v2020_v50 = vsub.f32 %v1695_v61, %v2000_v47 }
 0xcf5   :  { %v2029_v53 = vmul.f32 1.442695, %v2020_v50 }
 0xcf7   :  { %3609 = vpow2.f32 %v2029_v53 }
 0xcf8   :  { %3611 = vpow2.f32 %v2027_v57 }
 0xcf9   :  { %2187 = vrot.lane.b32.xlu1 %v4089_v26, %s3678_s29 }
 0xcfd   :  { %2235 = vrot.lane.b32.xlu1 %v4087_v25, %s3678_s29 }
 0xcfe   :  { %2139 = vrot.lane.b32.xlu0 %v4083_v15, %s3678_s29 }
 0xd04   :  { %v3610_v58 = vpop.eup %3609 }
 0xd05   :  { %v2046_v49 = vsel %vm198_vm4, %v3610_v58, 0.0  ;;  %v4182_v62 = vpop.eup %3611 }
 0xd06   :  { %v2043_v25 = vsel %vm198_vm4, %v4182_v62, 0.0 }
 0xd1d   :  { %2047 = vadd.xlane.f32.xlu0 %v2046_v49 }
 0xd21   :  { %2044 = vadd.xlane.f32.xlu1 %v2043_v25 }
 0xd61   :  { %v2003_v26 = vpop.xlane.xlu0 %2002 }
 0xd62   :  { %v2021_v15 = vsub.f32 %v1744_v20, %v2003_v26 }
 0xd64   :  { %v2031_v63 = vmul.f32 1.442695, %v2021_v15 }
 0xd65   :  { %v2006_v61 = vpop.xlane.xlu0 %2005 }
 0xd66   :  { %3613 = vpow2.f32 %v2031_v63  ;;  %v2022_v55 = vsub.f32 %v1793_v5, %v2006_v61 }
 0xd68   :  { %v2033_v35 = vmul.f32 1.442695, %v2022_v55 }
 0xd69   :  { %v2012_v2 = vpop.xlane.xlu0 %2011  ;;  %v2009_v5 = vpop.xlane.xlu1 %2008 }
 0xd6a   :  { %3615 = vpow2.f32 %v2033_v35  ;;  %v2023_v44 = vsub.f32 %v4165_v17, %v2009_v5  ;;  %v2024_v16 = vsub.f32 %v4167_v21, %v2012_v2 }
 0xd6c   :  { %v2035_v23 = vmul.f32 1.442695, %v2023_v44  ;;  %v2037_v27 = vmul.f32 1.442695, %v2024_v16 }
 0xd6e   :  { %3617 = vpow2.f32 %v2035_v23 }
 0xd6f   :  { %3619 = vpow2.f32 %v2037_v27  ;;  %v3063_v27 = vld [vmem:[%s4381_s4 + $0x10] sm:$0xf] }
 0xd71   :  { %v2018_v4 = vpop.xlane.xlu0 %2017  ;;  %v2015_v19 = vpop.xlane.xlu1 %2014 }
 0xd72   :  { %v2025_v24 = vsub.f32 %v1940_v28, %v2015_v19  ;;  %v2026_v29 = vsub.f32 %v1989_v38, %v2018_v4 }
 0xd73   :  { %v4186_v7 = vpop.eup %3613 }
 0xd74   :  { %v2049_v8 = vsel %vm198_vm4, %v4186_v7, 0.0  ;;  %v2039_v30 = vmul.f32 1.442695, %v2025_v24  ;;  %v2041_v33 = vmul.f32 1.442695, %v2026_v29 }
 0xd75   :  { %v2140_v10 = vpop.permute.xlu0 %2139  ;;  %2050 = vadd.xlane.f32.xlu1 %v2049_v8  ;;  %v2188_v34 = vpop.permute.xlu1 %2187 }
 0xd76   :  { %v2145_v11 = vsel %vm689_vm5, %v2140_v10, 0  ;;  %3621 = vpow2.f32 %v2039_v30  ;;  %v2193_v52 = vsel %vm689_vm5, %v2188_v34, 0  ;;  %v2482_v34 = vsel %vm689_vm5, %v3063_v27, 0 }
 0xd77   :  { %v4191_v12 = vpop.eup %3615  ;;  %3419 = vmatpush3.bf16.msra.mxu1 %v2145_v11  ;;  %3623 = vpow2.f32 %v2041_v33 }
 0xd78   :  { %v2052_v20 = vsel %vm198_vm4, %v4191_v12, 0.0  ;;  %3430 = vmatprep.subr.bf16.mxu1 %v3672_v0 }
 0xd79   :  { %2053 = vadd.xlane.f32.xlu0 %v2052_v20  ;;  %v2236_v43 = vpop.permute.xlu1 %2235 }
 0xd7a   :  { %v2241_v47 = vsel %vm689_vm5, %v2236_v43, 0  ;;  %v3065_v43 = vld [vmem:[%s4381_s4 + $0x14] sm:$0xf] }
 0xd86   :  { %2331 = vrot.lane.b32.xlu1 %v4096_v31, %s3678_s29  ;;  %v4202_v31 = vpop.eup %3617 }
 0xd87   :  { %v4204_v17 = vpop.eup %3619  ;;  %v2055_v21 = vsel %vm198_vm4, %v4202_v31, 0.0 }
 0xd88   :  { %v4208_v28 = vpop.eup %3621  ;;  %v2058_v39 = vsel %vm198_vm4, %v4204_v17, 0.0 }
 0xd89   :  { %v2061_v40 = vsel %vm198_vm4, %v4208_v28, 0.0  ;;  %v4214_v41 = vpop.eup %3623 }
 0xd8a   :  { %v2064_v13 = vsel %vm198_vm4, %v4214_v41, 0.0 }
 0xd8f   :  { %2283 = vrot.lane.b32.xlu0 %v4098_v32, %s3678_s29 }
 0xda6   :  { %v2048_v32 = vpop.xlane.xlu0 %2047 }
 0xda7   :  { %3625 = vrcp.f32 %v2048_v32  ;;  %v2537_v32 = vsel %vm689_vm5, %v3065_v43, 0 }
 0xdaa   :  { %2056 = vadd.xlane.f32.xlu1 %v2055_v21  ;;  %v2045_v38 = vpop.xlane.xlu1 %2044 }
 0xdab   :  { %3627 = vrcp.f32 %v2045_v38 }
 0xdae   :  { %2059 = vadd.xlane.f32.xlu0 %v2058_v39  ;;  %2062 = vadd.xlane.f32.xlu1 %v2061_v40 }
 0xdb2   :  { %2065 = vadd.xlane.f32.xlu0 %v2064_v13 }
 0xdb4   :  { %v3626_v42 = vpop.eup %3625 }
 0xdb5   :  { %v2076_v45 = vmul.f32 %v3626_v42, %v3610_v58 }
 0xdb7   :  { %v2084_v14 = vpack.c.bf16 %v2076_v45, %v2076_v45  ;;  %v3067_v45 = vld [vmem:[%s4381_s4 + $0x18] sm:$0xf] }
 0xdb8   :  { %v3628_v46 = vpop.eup %3627 }
 0xdb9   :  { %3421 = vmatmul.mubr.msk.bf16.vlgmr.msra.gmra.mxu1 %vm198_vm4, %v2084_v14  ;;  %v2075_v50 = vmul.f32 %v3628_v46, %v4182_v62  ;;  %v2588_v14 = vsel %vm689_vm5, %v3067_v45, 0 }
 0xdba   :  { %3431 = vmatpush3.bf16.msra.mxu1 %v2241_v47  ;;  %3432 = vmatprep.mubr.msk.bf16.mxu1 %vm3673_vm0, %v3672_v0 }
 0xdbb   :  { %v2083_v51 = vpack.c.bf16 %v2075_v50, %v2075_v50  ;;  %3442 = vmatprep.subr.bf16.mxu1 %v3672_v0  ;;  %v3069_v50 = vld [vmem:[%s4381_s4 + $0x1c] sm:$0xf] }
 0xdbd   :  { %3415 = vmatmul.mubr.msk.bf16.vlgmr.msra.gmra.mxu0 %vm198_vm4, %v2083_v51 }
 0xdbe   :  { %3425 = vmatpush3.bf16.msra.mxu0 %v2193_v52  ;;  %3426 = vmatprep.mubr.msk.bf16.mxu0 %vm3673_vm0, %v3672_v0 }
 0xdbf   :  { %2427 = vrot.lane.b32.xlu1 %v4109_v37, %s3678_s29  ;;  %3436 = vmatprep.subr.bf16.mxu0 %v3672_v0 }
 0xdc8   :  { %2379 = vrot.lane.b32.xlu0 %v4106_v48, %s3678_s29 }
 0xdfe   :  { %v2051_v53 = vpop.xlane.xlu1 %2050 }
 0xdff   :  { %3629 = vrcp.f32 %v2051_v53 }
 0xe02   :  { %v2054_v57 = vpop.xlane.xlu0 %2053  ;;  %v2332_v63 = vpop.permute.xlu1 %2331 }
 0xe03   :  { %3631 = vrcp.f32 %v2054_v57  ;;  %v2337_v61 = vsel %vm689_vm5, %v2332_v63, 0  ;;  %v2639_v57 = vsel %vm689_vm5, %v3069_v50, 0 }
 0xe06   :  { %v2284_v62 = vpop.permute.xlu0 %2283 }
 0xe07   :  { %v2289_v15 = vsel %vm689_vm5, %v2284_v62, 0 }
 0xe0c   :  { %v3630_v58 = vpop.eup %3629 }
 0xe0d   :  { %v2077_v49 = vmul.f32 %v3630_v58, %v4186_v7 }
 0xe0f   :  { %v2085_v25 = vpack.c.bf16 %v2077_v49, %v2077_v49 }
 0xe10   :  { %v3632_v26 = vpop.eup %3631 }
 0xe11   :  { %3427 = vmatmul.mubr.msk.bf16.vlgmr.msra.gmra.mxu0 %vm198_vm4, %v2085_v25  ;;  %v2078_v37 = vmul.f32 %v3632_v26, %v4191_v12 }
 0xe12   :  { %3437 = vmatpush3.bf16.msra.mxu0 %v2289_v15  ;;  %3438 = vmatprep.mubr.msk.bf16.mxu0 %vm3673_vm0, %v3672_v0 }
 0xe13   :  { %v2086_v48 = vpack.c.bf16 %v2078_v37, %v2078_v37  ;;  %3448 = vmatprep.subr.bf16.mxu0 %v3672_v0 }
 0xe15   :  { %3433 = vmatmul.mubr.msk.bf16.vlgmr.msra.gmra.mxu1 %vm198_vm4, %v2086_v48 }
 0xe16   :  { %3443 = vmatpush3.bf16.msra.mxu1 %v2337_v61  ;;  %3444 = vmatprep.mubr.msk.bf16.mxu1 %vm3673_vm0, %v3672_v0 }
 0xe17   :  { %3454 = vmatprep.subr.bf16.mxu1 %v3672_v0 }
 0xe33   :  { %v2057_v55 = vpop.xlane.xlu1 %2056 }
 0xe34   :  { %3633 = vrcp.f32 %v2057_v55 }
 0xe37   :  { %v2060_v35 = vpop.xlane.xlu0 %2059  ;;  %v2063_v2 = vpop.xlane.xlu1 %2062 }
 0xe38   :  { %3635 = vrcp.f32 %v2060_v35 }
 0xe39   :  { %3637 = vrcp.f32 %v2063_v2 }
 0xe3b   :  { %v2066_v4 = vpop.xlane.xlu0 %2065  ;;  %v2428_v19 = vpop.permute.xlu1 %2427 }
 0xe3c   :  { %3639 = vrcp.f32 %v2066_v4  ;;  %v2433_v29 = vsel %vm689_vm5, %v2428_v19, 0 }
 0xe3f   :  { %v2380_v10 = vpop.permute.xlu0 %2379 }
 0xe40   :  { %v2385_v5 = vsel %vm689_vm5, %v2380_v10, 0 }
 0xe41   :  { %v3634_v7 = vpop.eup %3633 }
 0xe42   :  { %v2079_v8 = vmul.f32 %v3634_v7, %v4202_v31 }
 0xe44   :  { %v2087_v11 = vpack.c.bf16 %v2079_v8, %v2079_v8 }
 0xe45   :  { %v3636_v12 = vpop.eup %3635 }
 0xe46   :  { %v3638_v20 = vpop.eup %3637  ;;  %3439 = vmatmul.mubr.msk.bf16.vlgmr.msra.gmra.mxu0 %vm198_vm4, %v2087_v11  ;;  %v2080_v44 = vmul.f32 %v3636_v12, %v4204_v17 }
 0xe47   :  { %3449 = vmatpush3.bf16.msra.mxu0 %v2385_v5  ;;  %3450 = vmatprep.mubr.msk.bf16.mxu0 %vm3673_vm0, %v3672_v0  ;;  %v2081_v23 = vmul.f32 %v3638_v20, %v4208_v28 }
 0xe48   :  { %v2088_v16 = vpack.c.bf16 %v2080_v44, %v2080_v44  ;;  %3460 = vmatprep.subr.bf16.mxu0 %v3672_v0 }
 0xe49   :  { %v3640_v24 = vpop.eup %3639  ;;  %v2089_v30 = vpack.c.bf16 %v2081_v23, %v2081_v23 }
 0xe4a   :  { %3445 = vmatmul.mubr.msk.bf16.vlgmr.msra.gmra.mxu1 %vm198_vm4, %v2088_v16  ;;  %v2082_v33 = vmul.f32 %v3640_v24, %v4214_v41 }
 0xe4b   :  { %3455 = vmatpush3.bf16.msra.mxu1 %v2433_v29  ;;  %3456 = vmatprep.mubr.msk.bf16.mxu1 %vm3673_vm0, %v3672_v0 }
 0xe4c   :  { %3466 = vmatprep.subr.bf16.mxu1 %v3672_v0  ;;  %v2090_v31 = vpack.c.bf16 %v2082_v33, %v2082_v33 }
 0xe4e   :  { %3451 = vmatmul.mubr.msk.bf16.vlgmr.msra.gmra.mxu0 %vm198_vm4, %v2089_v30 }
 0xe4f   :  { %3461 = vmatpush3.bf16.msra.mxu0 %v2482_v34  ;;  %3462 = vmatprep.mubr.msk.bf16.mxu0 %vm3673_vm0, %v3672_v0  ;;  %v2528_v34 = vrot.slane %v4074_v3, %v1120_v9 }
 0xe50   :  { %3472 = vmatprep.subr.bf16.mxu0 %v3672_v0 }
 0xe52   :  { %3457 = vmatmul.mubr.msk.bf16.vlgmr.msra.gmra.mxu1 %vm198_vm4, %v2090_v31 }
 0xe53   :  { %3468 = vmatprep.mubr.msk.bf16.mxu1 %vm3673_vm0, %v3672_v0  ;;  %3467 = vmatpush3.bf16.msra.mxu1 %v2537_v32 }
 0xe54   :  { %3478 = vmatprep.subr.bf16.mxu1 %v3672_v0 }
 0xe79   :  { %v2181_v17 = vpop.f32.mrf.mxu1 }
 0xe7b   :  { %v3422_v21 = vpop.f32.mrf.mxu1 }
 0xe7d   :  { %v2133_v28 = vpop.f32.mrf.mxu0  ;;  %v2184_v38 = vpop.f32.mrf.mxu1 }
 0xe7e   :  { %v2475_v39 = vpack.c.bf16 %v2181_v17, %v2133_v28 }
 0xe7f   :  { %v3416_v40 = vpop.f32.mrf.mxu0  ;;  %v3423_v41 = vpop.f32.mrf.mxu1 }
 0xe80   :  { %3463 = vmatmul.mubr.msk.bf16.vlgmr.msra.gmra.mxu0 %vm198_vm4, %v2475_v39 }
 0xe81   :  { %v2136_v13 = vpop.f32.mrf.mxu0  ;;  %3474 = vmatprep.mubr.msk.bf16.mxu0 %vm3673_vm0, %v3672_v0  ;;  %3473 = vmatpush3.bf16.msra.mxu0 %v2588_v14 }
 0xe82   :  { %3484 = vmatprep.subr.bf16.mxu0 %v3672_v0 }
 0xe83   :  { %v3417_v42 = vpop.f32.mrf.mxu0 }
 0xed1   :  { %v2229_v46 = vpop.f32.mrf.mxu0 }
 0xed3   :  { %v3428_v47 = vpop.f32.mrf.mxu0 }
 0xed5   :  { %v2232_v51 = vpop.f32.mrf.mxu0  ;;  %v2277_v52 = vpop.f32.mrf.mxu1 }
 0xed6   :  { %v2531_v53 = vpack.c.bf16 %v2277_v52, %v2229_v46 }
 0xed7   :  { %v3429_v58 = vpop.f32.mrf.mxu0  ;;  %v3434_v49 = vpop.f32.mrf.mxu1 }
 0xed8   :  { %3469 = vmatmul.mubr.msk.bf16.vlgmr.msra.gmra.mxu1 %vm198_vm4, %v2531_v53 }
 0xed9   :  { %v2280_v62 = vpop.f32.mrf.mxu1  ;;  %3479 = vmatpush3.bf16.msra.mxu1 %v2639_v57  ;;  %3480 = vmatprep.mubr.msk.bf16.mxu1 %vm3673_vm0, %v3672_v0 }
 0xeda   :  { %3492 = vmatprep.subr.bf16.mxu1 %v3672_v0 }
 0xedb   :  { %v3435_v25 = vpop.f32.mrf.mxu1 }
 0xf06   :  { %v2325_v26 = vpop.f32.mrf.mxu0 }
 0xf08   :  { %v3440_v15 = vpop.f32.mrf.mxu0 }
 0xf0a   :  { %v2328_v37 = vpop.f32.mrf.mxu0  ;;  %v2373_v63 = vpop.f32.mrf.mxu1 }
 0xf0b   :  { %v2582_v48 = vpack.c.bf16 %v2373_v63, %v2325_v26  ;;  %v3564_v63 = vld [vmem:[%s4382_s5 + $0x10] sm:$0xff]  }
 0xf0c   :  { %v3441_v61 = vpop.f32.mrf.mxu0  ;;  %v3446_v55 = vpop.f32.mrf.mxu1 }
 0xf0d   :  { %3475 = vmatmul.mubr.msk.bf16.vlgmr.msra.gmra.mxu0 %vm198_vm4, %v2582_v48  ;;  %v3565_v48 = vld [vmem:[%s4383_s6 + $0x38] sm:$0xff]  }
 0xf0e   :  { %v2376_v35 = vpop.f32.mrf.mxu1  ;;  %v2421_v2 = vpop.f32.mrf.mxu0  ;;  %3488 = vmatprep.mubr.msk.bf16.mxu0 %vm3673_vm0, %v3672_v0 }
 0xf10   :  { %v3447_v4 = vpop.f32.mrf.mxu1  ;;  %v3452_v7 = vpop.f32.mrf.mxu0 }
 0xf12   :  { %v2424_v8 = vpop.f32.mrf.mxu0  ;;  %v2469_v10 = vpop.f32.mrf.mxu1 }
 0xf13   :  { %v2633_v11 = vpack.c.bf16 %v2469_v10, %v2421_v2 }
 0xf14   :  { %v3453_v12 = vpop.f32.mrf.mxu0  ;;  %v3458_v20 = vpop.f32.mrf.mxu1 }
 0xf15   :  { %3481 = vmatmul.mubr.msk.bf16.vlgmr.msra.gmra.mxu1 %vm198_vm4, %v2633_v11  ;;  %v2715_v11 = vrot.slane %v4074_v3, %v1308_v56  ;;  %v3566_v56 = vld [vmem:[%s4383_s6 + $0x30] sm:$0xff]  }
 0xf16   :  { %v2472_v5 = vpop.f32.mrf.mxu1  ;;  %3500 = vmatprep.mubr.msk.bf16.mxu1 %vm3673_vm0, %v3672_v0  ;;  %3493 = vmatpush3.bf16.msra.mxu1 %v3565_v48 }
 0xf17   :  { %3494 = vmatprep.subr.bf16.mxu1 %v3672_v0 }
 0xf18   :  { %v3459_v44 = vpop.f32.mrf.mxu1 }
 0xf19   :  { %v2721_v44 = vrot.slane %v4074_v3, %v1314_v60  ;;  %v3567_v60 = vld [vmem:[%s4383_s6 + $0x28] sm:$0xff]  }
 0xf1a   :  { %3495 = vmatpush3.bf16.msra.mxu1 %v3566_v56 }
 0xf1b   :  { %3496 = vmatprep.subr.bf16.mxu1 %v3672_v0 }
 0xf1e   :  { %3497 = vmatpush3.bf16.msra.mxu1 %v3567_v60 }
 0xf1f   :  { %3498 = vmatprep.subr.bf16.mxu1 %v3672_v0 }
 0xf40   :  { %v2518_v19 = vpop.f32.mrf.mxu0 }
 0xf41   :  { %v2529_v32 = vadd.f32 %v2528_v34, %v2518_v19 }
 0xf42   :  { %v3464_v16 = vpop.f32.mrf.mxu0 }
 0xf44   :  { %v2521_v23 = vpop.f32.mrf.mxu0 }
 0xf45   :  { %v2530_v38 = vadd.f32 %v2528_v34, %v2521_v23 }
 0xf46   :  { %v3465_v24 = vpop.f32.mrf.mxu0 }
 0xf98   :  { %v2573_v27 = vpop.f32.mrf.mxu1 }
 0xf99   :  { %v2580_v21 = vadd.f32 %v2573_v27, %v2529_v32  ;;  %v3568_v27 = vld [vmem:[%s4383_s6 + $0x20] sm:$0xff]  }
 0xf9a   :  { %v3470_v29 = vpop.f32.mrf.mxu1  ;;  %3499 = vmatpush3.bf16.msra.mxu1 %v3568_v27 }
 0xf9b   :  { %v2733_v29 = vrot.slane %v4074_v3, %v1325_v6 }
 0xf9c   :  { %v2576_v30 = vpop.f32.mrf.mxu1 }
 0xf9d   :  { %v2581_v41 = vadd.f32 %v2576_v30, %v2530_v38  ;;  %v2805_v38 = vrot.slane %v4074_v3, %v1396_v22 }
 0xf9e   :  { %v3471_v33 = vpop.f32.mrf.mxu1 }
 0xfcd   :  { %v2624_v31 = vpop.f32.mrf.mxu0 }
 0xfce   :  { %v2631_v39 = vadd.f32 %v2624_v31, %v2580_v21 }
 0xfcf   :  { %v3476_v43 = vpop.f32.mrf.mxu0 }
 0xfd1   :  { %v2627_v17 = vpop.f32.mrf.mxu0 }
 0xfd2   :  { %v2632_v45 = vadd.f32 %v2627_v17, %v2581_v41 }
 0xfd3   :  { %v3477_v28 = vpop.f32.mrf.mxu0 }
 0xfd5   :  { %v2675_v40 = vpop.f32.mrf.mxu1 }
 0xfd6   :  { %v2682_v13 = vadd.f32 %v2675_v40, %v2631_v39 }
 0xfd7   :  { %v3482_v42 = vpop.f32.mrf.mxu1 }
 0xfd8   :  { %v2684_v14 = vadd.f32 %v2682_v13, %v4062_v36 }
 0xfd9   :  { %v2678_v46 = vpop.f32.mrf.mxu1 }
 0xfda   :  { %v2683_v47 = vadd.f32 %v2678_v46, %v2632_v45  ;;  %v2686_v50 = vsel %vm122_vm3, %v2684_v14, 0.0 }
 0xfdb   :  { %v3483_v9 = vpop.f32.mrf.mxu1  ;;  %2687 = vadd.xlane.f32.xlu0 %v2686_v50 }
 0xfdc   :  { %v2685_v51 = vadd.f32 %v2683_v47, %v4064_v1  ;;  %v3563_v1 = vld [vmem:[%s4382_s5 + $0x18] sm:$0xff]  }
 0xfdd   :  { %3485 = vmatpush3.bf16.msra.mxu0 %v3563_v1 }
 0xfde   :  { %v2689_v52 = vsel %vm122_vm3, %v2685_v51, 0.0  ;;  %3486 = vmatprep.subr.bf16.mxu0 %v3672_v0 }
 0xfdf   :  { %2690 = vadd.xlane.f32.xlu1 %v2689_v52 }
 0xfe1   :  { %3487 = vmatpush3.bf16.msra.mxu0 %v3564_v63 }
 0xfe2   :  { %3504 = vmatprep.subr.mxu0 %v3672_v0 }
0x1064   :  { %v2688_v53 = vpop.xlane.xlu0 %2687 }
0x1065   :  { %v2692_v57 = vmul.f32 0.03125, %v2688_v53 }
0x1067   :  { %v2694_v58 = vsub.f32 %v2684_v14, %v2692_v57 }
0x1068   :  { %v2691_v49 = vpop.xlane.xlu1 %2690 }
0x1069   :  { %v2693_v62 = vmul.f32 0.03125, %v2691_v49  ;;  %v2696_v25 = vmul.f32 %v2694_v58, %v2694_v58 }
0x106b   :  { %v2695_v26 = vsub.f32 %v2685_v51, %v2693_v62  ;;  %v2698_v36 = vsel %vm122_vm3, %v2696_v25, 0.0  ;;  %v2917_v25 = vld [vmem:[%s4385_s8 + $0x18] sm:$0xff] }
0x106c   :  { %2699 = vadd.xlane.f32.xlu0 %v2698_v36  ;;  %v2915_v36 = vld [vmem:[%s4385_s8 + $0x8] sm:$0xff] }
0x106d   :  { %v2697_v15 = vmul.f32 %v2695_v26, %v2695_v26 }
0x106f   :  { %v2701_v37 = vsel %vm122_vm3, %v2697_v15, 0.0  ;;  %v2914_v15 = vld [vmem:[%s4385_s8] sm:$0xff] }
0x1070   :  { %2702 = vadd.xlane.f32.xlu0 %v2701_v37 }
0x10f5   :  { %v2700_v61 = vpop.xlane.xlu0 %2699 }
0x10f6   :  { %v2704_v55 = vmul.f32 0.03125, %v2700_v61 }
0x10f8   :  { %v2706_v35 = vadd.f32 1e-05, %v2704_v55 }
0x10f9   :  { %v2703_v2 = vpop.xlane.xlu0 %2702 }
0x10fa   :  { %3641 = vrsqrt.f32 %v2706_v35  ;;  %v2705_v4 = vmul.f32 0.03125, %v2703_v2 }
0x10fc   :  { %v2707_v7 = vadd.f32 1e-05, %v2705_v4  ;;  %v2905_v4 = vrot.slane %v4074_v3, %v1497_v54 }
0x10fe   :  { %3643 = vrsqrt.f32 %v2707_v7 }
0x1107   :  { %v3642_v8 = vpop.eup %3641 }
0x1108   :  { %v2710_v10 = vmul.f32 %v3642_v8, %v2694_v58 }
0x110a   :  { %v2716_v5 = vmul.f32 %v2715_v11, %v2710_v10 }
0x110b   :  { %v3644_v12 = vpop.eup %3643 }
0x110c   :  { %v2711_v20 = vmul.f32 %v3644_v12, %v2695_v26  ;;  %v2722_v16 = vadd.f32 %v2721_v44, %v2716_v5  ;;  %v2916_v26 = vld [vmem:[%s4385_s8 + $0x10] sm:$0xff] }
0x110e   :  { %v2717_v19 = vmul.f32 %v2715_v11, %v2711_v20 }
0x1110   :  { %v2723_v23 = vadd.f32 %v2721_v44, %v2717_v19  ;;  %v3091_v19 = vld [vmem:[%s4385_s8 + $0x20] ss:$0 sm:$0xff] }
0x1112   :  { %v2724_v24 = vpack.c.bf16 %v2723_v23, %v2722_v16 }
0x1114   :  { %3489 = vmatmul.mubr.msk.bf16.vlgmr.msra.gmra.mxu0 %vm122_vm3, %v2724_v24 }
0x1115   :  { %3512 = vmatprep.mubr.msk.f32.mxu0 %vm3673_vm0, %v3672_v0  ;;  %3505 = vmatpush3.msra.mxu0 %v2917_v25 }
0x1116   :  { %3506 = vmatprep.subr.mxu0 %v3672_v0 }
0x1117   :  { %3507 = vmatpush3.msra.mxu0 %v2916_v26 }
0x1118   :  { %3508 = vmatprep.subr.mxu0 %v3672_v0 }
0x1119   :  { %3509 = vmatpush3.msra.mxu0 %v2915_v36 }
0x111a   :  { %3510 = vmatprep.subr.mxu0 %v3672_v0  ;;  %v2911_v0 = vrot.slane %v4074_v3, %v1503_v59 }
0x111b   :  { %3511 = vmatpush3.msra.mxu0 %v2914_v15 }
0x11d4   :  { %v2783_v30 = vpop.f32.mrf.mxu0 }
0x11d5   :  { %v2784_v34 = vadd.f32 %v2783_v30, %v2733_v29 }
0x11d6   :  { %v3490_v33 = vpop.f32.mrf.mxu0 }
0x11d7   :  { %v2790_v17 = vmax.f32 %v2784_v34, 0.0 }
0x11d8   :  { %v2786_v31 = vpop.f32.mrf.mxu0 }
0x11d9   :  { %v2787_v43 = vadd.f32 %v2786_v31, %v2733_v29 }
0x11da   :  { %v3491_v32 = vpop.f32.mrf.mxu0 }
0x11db   :  { %v2791_v21 = vmax.f32 %v2787_v43, 0.0 }
0x11dd   :  { %v2792_v28 = vpack.c.bf16 %v2791_v21, %v2790_v17 }
0x11df   :  { %3501 = vmatmul.mubr.msk.bf16.vlgmr.msra.gmra.mxu1 %vm1422_vm6, %v2792_v28 }
0x129f   :  { %v2867_v39 = vpop.f32.mrf.mxu1 }
0x12a0   :  { %v2868_v40 = vadd.f32 %v2867_v39, %v2805_v38 }
0x12a1   :  { %v3502_v41 = vpop.f32.mrf.mxu1 }
0x12a2   :  { %v2874_v13 = vadd.f32 %v2868_v40, %v2722_v16 }
0x12a3   :  { %v2870_v6 = vpop.f32.mrf.mxu1 }
0x12a4   :  { %v2871_v42 = vadd.f32 %v2870_v6, %v2805_v38  ;;  %v2876_v45 = vsel %vm122_vm3, %v2874_v13, 0.0 }
0x12a5   :  { %2877 = vadd.xlane.f32.xlu0 %v2876_v45  ;;  %v3503_v14 = vpop.f32.mrf.mxu1 }
0x12a6   :  { %v2875_v46 = vadd.f32 %v2871_v42, %v2723_v23 }
0x12a8   :  { %v2879_v47 = vsel %vm122_vm3, %v2875_v46, 0.0 }
0x12a9   :  { %2880 = vadd.xlane.f32.xlu1 %v2879_v47 }
0x132e   :  { %v2878_v50 = vpop.xlane.xlu0 %2877 }
0x132f   :  { %v2882_v9 = vmul.f32 0.03125, %v2878_v50 }
0x1331   :  { %v2884_v51 = vsub.f32 %v2874_v13, %v2882_v9 }
0x1332   :  { %v2881_v52 = vpop.xlane.xlu1 %2880 }
0x1333   :  { %v2883_v53 = vmul.f32 0.03125, %v2881_v52  ;;  %v2886_v22 = vmul.f32 %v2884_v51, %v2884_v51 }
0x1335   :  { %v2885_v57 = vsub.f32 %v2875_v46, %v2883_v53  ;;  %v2888_v58 = vsel %vm122_vm3, %v2886_v22, 0.0 }
0x1336   :  { %2889 = vadd.xlane.f32.xlu0 %v2888_v58 }
0x1337   :  { %v2887_v49 = vmul.f32 %v2885_v57, %v2885_v57 }
0x1339   :  { %v2891_v62 = vsel %vm122_vm3, %v2887_v49, 0.0 }
0x133a   :  { %2892 = vadd.xlane.f32.xlu1 %v2891_v62 }
0x13bf   :  { %v2890_v37 = vpop.xlane.xlu0 %2889 }
0x13c0   :  { %v2894_v1 = vmul.f32 0.03125, %v2890_v37 }
0x13c2   :  { %v2896_v63 = vadd.f32 1e-05, %v2894_v1 }
0x13c3   :  { %v2893_v48 = vpop.xlane.xlu1 %2892 }
0x13c4   :  { %3645 = vrsqrt.f32 %v2896_v63  ;;  %v2895_v61 = vmul.f32 0.03125, %v2893_v48 }
0x13c6   :  { %v2897_v55 = vadd.f32 1e-05, %v2895_v61 }
0x13c8   :  { %3647 = vrsqrt.f32 %v2897_v55 }
0x13d1   :  { %v3646_v35 = vpop.eup %3645 }
0x13d2   :  { %v2900_v2 = vmul.f32 %v3646_v35, %v2884_v51 }
0x13d4   :  { %v2906_v10 = vmul.f32 %v2905_v4, %v2900_v2 }
0x13d5   :  { %v3648_v7 = vpop.eup %3647 }
0x13d6   :  { %v2901_v8 = vmul.f32 %v3648_v7, %v2885_v57  ;;  %v2912_v20 = vadd.f32 %v2911_v0, %v2906_v10 }
0x13d8   :  { %v2907_v11 = vmul.f32 %v2905_v4, %v2901_v8 }
0x13da   :  { %v2913_v12 = vadd.f32 %v2911_v0, %v2907_v11 }
0x13dc   :  { %v2925_v5 = vrot.slane %v2913_v12, 7 }
0x13de   :  { %v2927_v44 = vsel %vm2926_vm7, %v2925_v5, %v2912_v20 }
0x13df   :  { %3513 = vmatmul.mubr.msk.f32.vlgmr.msra.gmra.mxu0 %vm122_vm3, %v2927_v44 }
0x149f   :  { %v2996_v54 = vpop.f32.mrf.mxu0 }
0x14a0   :  { %v2997_v16 = vadd.f32 %v3091_v19, %v2996_v54 }
0x14a1   :  { %v3514_v23 = vpop.f32.mrf.mxu0 }
0x14a2   :  { %3001 = vst.msk [vmem:[%s4386_s9] sm:$0x3] %vm3000_vm8, %v2997_v16 }
0x14a3   :  { %3006 = vsyncpa [#allocation3], 1 }

</bundles_post_ra>
